<compile_context>
chip_gen: v6e
topology: v6e:2x2x1
jax: 0.10.0
libtpu: 0.0.40
codegen_flags: <defaults>
</compile_context>

<pallas_src>
import functools

import jax
import jax.numpy as jnp
from jax import lax
from jax.experimental import pallas as pl
from jax.experimental.pallas import tpu as pltpu

MIB = 1024 * 1024


# ---------------------------------------------------------------------------
# helpers
# ---------------------------------------------------------------------------
def _round_up(x, m):
    return ((x + m - 1) // m) * m


def _softplus(a):
    # numerically stable log(1 + exp(a))
    return jnp.maximum(a, 0.0) + jnp.log1p(jnp.exp(-jnp.abs(a)))


def _apply_nonlinearity(a, kind):
    """Static selection mirroring `computef` from the PyTorch module."""
    if kind == "linear":
        return a
    if kind == "logistic":
        return jax.nn.sigmoid(a)
    if kind == "smoothReLU":
        return _softplus(a)
    if kind == "ReLU":
        return jnp.maximum(a, 0.0)
    if kind == "swish":
        return a * jax.nn.sigmoid(a)
    if kind == "mish":
        return a * jnp.tanh(_softplus(a))
    if kind == "GELU":
        return 0.5 * a * (1.0 + jnp.tanh(jnp.sqrt(2.0 / jnp.pi) * (a + 0.044715 * a ** 3)))
    if kind == "ELU":
        return jnp.where(a < 0, jnp.exp(a) - 1.0, a)
    if kind == "tanh":
        return jnp.tanh(a)
    if kind == "tanhlecun":
        return 1.7159 * jnp.tanh(2.0 / 3.0 * a)
    if kind == "lineartanh":
        return jnp.clip(a, -1.0, 1.0)
    if kind == "retanh":
        return jnp.maximum(jnp.tanh(a), 0.0)
    if kind == "binarymeanzero":
        return jnp.where(a >= 0, 1.0, -1.0)
    # TODO(synk): 'tanhwithslope' needs an extra slope argument; not plumbed.
    raise ValueError(f"Unknown transfer function type: {kind}")


def _vmem_cap_bytes():
    """Generation-aware VMEM budget for the pallas_call."""
    try:
        total = int(pltpu.get_tpu_info().vmem_capacity_bytes)
    except Exception:
        total = 64 * MIB                      # unknown -> assume v7x-sized VMEM
    if total <= 64 * MIB:                     # v7x: leave compiler-scratch headroom
        return 46 * MIB
    return 100 * MIB                          # v5e / v6e: exploit the 128 MiB


def _has_two_tensorcores():
    try:
        kind = jax.devices()[0].device_kind.lower()
    except Exception:
        return False
    return "v7" in kind


def _vmem_estimate(TB, BT, Dp, Hp, in_bytes, out_bytes):
    stream_in = 2 * TB * BT * (Dp + Hp) * in_bytes        # x + bh (double-buffered)
    stream_out = 2 * TB * BT * Hp * out_bytes              # hstore (double-buffered)
    scratch = TB * BT * 3 * Hp * 4 + BT * Hp * 4           # gx block + h carry
    weights = 2 * ((Dp + Hp) * 3 * Hp * in_bytes + 8 * Hp * 4)
    return stream_in + stream_out + scratch + weights


# ---------------------------------------------------------------------------
# Pallas kernel: one grid step == (one batch tile, TB timesteps)
# ---------------------------------------------------------------------------
def gru_kernel(nonlinearity, Hp, TB,
               x_ref,       # (TB, BT, Din)  raw inputs (compute dtype)
               bh_ref,      # (TB, BT, Hp)   bhneverlearn (compute dtype)
               h0_ref,      # (1, Hp)        initial hidden state (f32)
               wx_ref,      # (Din, 3Hp)     fused [Wrx|Wzx|Wnx]^T (compute dtype)
               bx_ref,      # (1, 3Hp)       fused [brh|bzh|bnx]   (f32)
               wh_ref,      # (Hp, 3Hp)      fused [Wrh|Wzh|Wnh]^T (compute dtype)
               bnh_ref,     # (1, Hp)        bias inside r * (Wnh h + bnh) (f32)
               h_out_ref,   # (TB, BT, Hp)   hstore (compute dtype)
               gx_scr,      # (TB, BT, 3Hp)  f32 input-projection scratch
               h_scr):      # (BT, Hp)       f32 hidden-state carry across blocks
    BT = h_scr.shape[0]

    # time axis is grid axis 1 (innermost); re-init the carry per batch tile.
    @pl.when(pl.program_id(1) == 0)
    def _():
        h_scr[...] = jnp.broadcast_to(h0_ref[...], h_scr.shape)

    # --- prologue: all TB input projections with ONE MXU matmul -------------
    Dp = x_ref.shape[-1]
    x2 = x_ref[...].reshape(TB * BT, Dp)
    gx = jnp.dot(x2, wx_ref[...], preferred_element_type=jnp.float32)   # (TB*BT, 3Hp)
    gx_scr[...] = gx.reshape(TB, BT, 3 * Hp) + bx_ref[...]              # +[brh|bzh|bnx]

    # --- recurrence: h carried in vregs through the unrolled loop -----------
    def step(i, h):                                       # h: (BT, Hp) f32
        gh = jnp.dot(h.astype(wh_ref.dtype), wh_ref[...],
                     preferred_element_type=jnp.float32)  # (BT, 3Hp)
        # consume gate-by-gate to limit live vregs
        r = jax.nn.sigmoid(gx_scr[i, :, 0:Hp] + gh[:, 0:Hp])
        z = jax.nn.sigmoid(gx_scr[i, :, Hp:2 * Hp] + gh[:, Hp:2 * Hp])
        n = _apply_nonlinearity(
            gx_scr[i, :, 2 * Hp:3 * Hp] + r * (gh[:, 2 * Hp:3 * Hp] + bnh_ref[...]),
            nonlinearity)
        h_new = (1.0 - z) * n + z * h + bh_ref[i].astype(jnp.float32)
        h_out_ref[i] = h_new.astype(h_out_ref.dtype)
        return h_new

    h_final = lax.fori_loop(0, TB, step, h_scr[...], unroll=True)
    h_scr[...] = h_final                                   # carry to next time block


# ---------------------------------------------------------------------------
# Parameter init (deterministic, mirrors shapes from GRU.__init__)
# ---------------------------------------------------------------------------
def init_gru_params(key, dim_input, dim_recurrent, dim_output, LEARN_h0=False):
    ks = jax.random.split(key, 7)

    def lin_w(k, out_dim, in_dim):
        bound = 1.0 / jnp.sqrt(jnp.float32(in_dim))
        return jax.random.uniform(k, (out_dim, in_dim), jnp.float32, -bound, bound)

    params = {
        "Wrx": lin_w(ks[0], dim_recurrent, dim_input),      # fc_r_x2r (no bias)
        "Wrh": lin_w(ks[1], dim_recurrent, dim_recurrent),  # fc_r_h2r
        "brh": jnp.zeros((dim_recurrent,), jnp.float32),
        "Wzx": lin_w(ks[2], dim_recurrent, dim_input),      # fc_z_x2z (no bias)
        "Wzh": lin_w(ks[3], dim_recurrent, dim_recurrent),  # fc_z_h2z
        "bzh": jnp.zeros((dim_recurrent,), jnp.float32),
        "Wnx": lin_w(ks[4], dim_recurrent, dim_input),      # fc_n_x2n
        "bnx": jnp.zeros((dim_recurrent,), jnp.float32),
        "Wnh": lin_w(ks[5], dim_recurrent, dim_recurrent),  # fc_n_h2n
        "bnh": jnp.zeros((dim_recurrent,), jnp.float32),
        "Wy": lin_w(ks[6], dim_output, dim_recurrent),      # fc_y_h2y
        "by": jnp.zeros((dim_output,), jnp.float32),
    }
    if LEARN_h0:
        params["h0"] = jnp.zeros((dim_recurrent,), jnp.float32)
    return params


# ---------------------------------------------------------------------------
# Wrapper: PyTorch-style (numtrials, numT, dim) in / out
# ---------------------------------------------------------------------------
def gru_forward(params, inp, bhneverlearn, nonlinearity="tanh",
                time_block=None, compute_dtype=jnp.bfloat16):
    if inp.ndim == 2:
        inp = inp[None, :, :]
        bhneverlearn = bhneverlearn[None, :, :]

    B, T, Din = inp.shape
    H = params["Wrh"].shape[0]
    f32 = jnp.float32
    hp = lax.Precision.HIGHEST

    inp = inp.astype(f32)
    bh = bhneverlearn.astype(f32)

    in_b = 4 if compute_dtype == jnp.float32 else 2
    sub = 8 if compute_dtype == jnp.float32 else 16        # sublane multiple per dtype

    # padded / tiled sizes
    Hp = _round_up(H, 128)                                  # lanes
    dH = Hp - H

    BT = min(_round_up(B, sub), 128)                        # batch tile
    if _has_two_tensorcores() and B > sub and (B + BT - 1) // BT < 2:
        # v7x: make sure the "parallel" batch axis has >=2 tiles for 2 TCs.
        BT = min(BT, _round_up((B + 1) // 2, sub))
    Bp = _round_up(B, BT)

    vmem_cap = _vmem_cap_bytes()
    if time_block is None:
        time_block = 32                                     # sweepable: 16/32/64
    TB = max(8, min(int(time_block), _round_up(T, 8)))
    while TB > 8 and _vmem_estimate(TB, BT, Din, Hp, in_b, in_b) > vmem_cap:
        TB = max(8, TB // 2)
    Tp = _round_up(T, TB)

    def pad_w_x(w):   # (H, Din) -> (Hp, Din)
        return jnp.pad(w.astype(f32), ((0, dH), (0, 0)))

    def pad_w_h(w):   # (H, H) -> (Hp, Hp)
        return jnp.pad(w.astype(f32), ((0, dH), (0, dH)))

    def pad_b(b):     # (H,) -> (Hp,)
        return jnp.pad(b.astype(f32), (0, dH))

    # fused weights; zero padding guarantees padded lanes never leak into real ones
    Wx3 = jnp.concatenate(
        [pad_w_x(params["Wrx"]), pad_w_x(params["Wzx"]), pad_w_x(params["Wnx"])],
        axis=0).T.astype(compute_dtype)                     # (Din, 3Hp)
    bx3 = jnp.concatenate(
        [pad_b(params["brh"]), pad_b(params["bzh"]), pad_b(params["bnx"])]
    ).reshape(1, 3 * Hp)                                    # (1, 3Hp) f32
    Wh3 = jnp.concatenate(
        [pad_w_h(params["Wrh"]), pad_w_h(params["Wzh"]), pad_w_h(params["Wnh"])],
        axis=0).T.astype(compute_dtype)                     # (Hp, 3Hp)
    bnh = pad_b(params["bnh"]).reshape(1, Hp)               # (1, Hp) f32
    h0 = pad_b(params.get("h0", jnp.zeros((H,), f32))).reshape(1, Hp)

    # time-major streams (transpose the narrow inp, not a 3Hp-wide intermediate)
    x_tm = jnp.pad(jnp.transpose(inp, (1, 0, 2)),
                   ((0, Tp - T), (0, Bp - B), (0, 0))).astype(compute_dtype)
    bh_tm = jnp.pad(jnp.transpose(bh, (1, 0, 2)),
                    ((0, Tp - T), (0, Bp - B), (0, dH))).astype(compute_dtype)

    grid = (Bp // BT, Tp // TB)            # batch tiles (parallel), time (arbitrary)
    t_blk = lambda b, t: (t, b, 0)
    const2 = lambda b, t: (0, 0)

    est = _vmem_estimate(TB, BT, Din, Hp, in_b, in_b)
    vmem_limit = int(min(max(int(1.5 * est), 32 * MIB), vmem_cap))

    h_tm = pl.pallas_call(
        functools.partial(gru_kernel, nonlinearity, Hp, TB),
        out_shape=jax.ShapeDtypeStruct((Tp, Bp, Hp), compute_dtype),
        grid_spec=pltpu.PrefetchScalarGridSpec(
            num_scalar_prefetch=0,
            grid=grid,
            in_specs=[
                pl.BlockSpec((TB, BT, Din), t_blk),      # raw inputs
                pl.BlockSpec((TB, BT, Hp), t_blk),       # bhneverlearn
                pl.BlockSpec((1, Hp), const2),           # h0
                pl.BlockSpec((Din, 3 * Hp), const2),     # fused input weights
                pl.BlockSpec((1, 3 * Hp), const2),       # fused input biases
                pl.BlockSpec((Hp, 3 * Hp), const2),      # fused recurrent weights
                pl.BlockSpec((1, Hp), const2),           # bnh
            ],
            out_specs=pl.BlockSpec((TB, BT, Hp), t_blk), # hstore (time-major)
            scratch_shapes=[
                pltpu.VMEM((TB, BT, 3 * Hp), f32),       # per-block gx scratch
                pltpu.VMEM((BT, Hp), f32),               # hidden-state carry
            ]),
        compiler_params=pltpu.CompilerParams(
            dimension_semantics=("parallel", "arbitrary"),
            vmem_limit_bytes=vmem_limit),
    )(x_tm, bh_tm, h0, Wx3, bx3, Wh3, bnh)

    # output projection computed from the time-major hstore (no extra HBM pass
    # over a transposed copy); only y (small) and hstore itself get transposed.
    h_tm_sl = h_tm[:T, :B, :H].astype(f32)                  # (T, B, H)
    y_tm = jnp.einsum("tbh,oh->tbo", h_tm_sl, params["Wy"].astype(f32),
                      precision=hp) + params["by"].astype(f32)
    y = jnp.transpose(y_tm, (1, 0, 2))                      # (B, T, O)
    hstore = jnp.transpose(h_tm_sl, (1, 0, 2))              # (B, T, H)
    return y, hstore


# ---------------------------------------------------------------------------
# Pure-JAX reference (mirrors the PyTorch forward) for verification
# ---------------------------------------------------------------------------
def gru_forward_ref(params, inp, bh, nonlinearity="tanh"):
    B, T, _ = inp.shape
    H = params["Wrh"].shape[0]
    hp = lax.Precision.HIGHEST
    h = params.get("h0", jnp.zeros((H,), jnp.float32)) * jnp.ones((B, H), jnp.float32)
    hs = []
    for t in range(T):
        x = inp[:, t]
        r = jax.nn.sigmoid(jnp.dot(x, params["Wrx"].T, precision=hp)
                           + jnp.dot(h, params["Wrh"].T, precision=hp) + params["brh"])
        z = jax.nn.sigmoid(jnp.dot(x, params["Wzx"].T, precision=hp)
                           + jnp.dot(h, params["Wzh"].T, precision=hp) + params["bzh"])
        n = _apply_nonlinearity(
            jnp.dot(x, params["Wnx"].T, precision=hp) + params["bnx"]
            + r * (jnp.dot(h, params["Wnh"].T, precision=hp) + params["bnh"]),
            nonlinearity)
        h = (1.0 - z) * n + z * h + bh[:, t, :]
        hs.append(h)
    hstore = jnp.stack(hs, axis=1)
    y = jnp.einsum("bth,oh->bto", hstore, params["Wy"], precision=hp) + params["by"]
    return y, hstore


if __name__ == "__main__":
    B, T = 2, 8
    dim_input, dim_recurrent, dim_output = 4, 32, 8

    key = jax.random.PRNGKey(0)
    kp, kx, kb = jax.random.split(key, 3)

    params = init_gru_params(kp, dim_input, dim_recurrent, dim_output, LEARN_h0=False)
    x = jax.random.normal(kx, (B, T, dim_input), jnp.float32)
    bhneverlearn = 0.1 * jax.random.normal(kb, (B, T, dim_recurrent), jnp.float32)

    y_ref, h_ref = gru_forward_ref(params, x, bhneverlearn, nonlinearity="tanh")

    # --- f32 validation path (tight tolerance) ---
    y32, h32 = gru_forward(params, x, bhneverlearn, nonlinearity="tanh",
                           compute_dtype=jnp.float32)
    jax.block_until_ready((y32, h32))
    assert y32.shape == (B, T, dim_output) and h32.shape == (B, T, dim_recurrent)
    assert jnp.allclose(h32, h_ref, atol=1e-3, rtol=1e-3), \
        float(jnp.max(jnp.abs(h32 - h_ref)))
    assert jnp.allclose(y32, y_ref, atol=1e-3, rtol=1e-3), \
        float(jnp.max(jnp.abs(y32 - y_ref)))

    # --- bf16 fast path (relaxed tolerance) ---
    y16, h16 = gru_forward(params, x, bhneverlearn, nonlinearity="tanh",
                           compute_dtype=jnp.bfloat16)
    jax.block_until_ready((y16, h16))
    assert jnp.allclose(h16, h_ref, atol=5e-2, rtol=5e-2), \
        float(jnp.max(jnp.abs(h16 - h_ref)))
    assert jnp.allclose(y16, y_ref, atol=5e-2, rtol=5e-2), \
        float(jnp.max(jnp.abs(y16 - y_ref)))

    print("KERNEL_OK")
</pallas_src>

<mosaic_0001>
module attributes {stable_mosaic.version = 11 : i64} {
  func.func @gru_kernel(%arg0: i32, %arg1: i32, %arg2: memref<8x8x4xf32, #tpu.memory_space<vmem>>, %arg3: memref<8x8x128xf32, #tpu.memory_space<vmem>>, %arg4: memref<1x128xf32, #tpu.memory_space<vmem>>, %arg5: memref<4x384xf32, #tpu.memory_space<vmem>>, %arg6: memref<1x384xf32, #tpu.memory_space<vmem>>, %arg7: memref<128x384xf32, #tpu.memory_space<vmem>>, %arg8: memref<1x128xf32, #tpu.memory_space<vmem>>, %arg9: memref<8x8x128xf32, #tpu.memory_space<vmem>>, %arg10: memref<8x8x384xf32, #tpu.memory_space<vmem>>, %arg11: memref<8x128xf32, #tpu.memory_space<vmem>>) attributes {dimension_semantics = [#tpu.dimension_semantics<parallel>, #tpu.dimension_semantics<arbitrary>], iteration_bounds = array<i64: 1, 1>, scalar_prefetch = 0 : i64, scratch_operands = 2 : i64, tpu.core_type = #tpu.core_type<tc>, window_params = [{transform_indices = @transform_0, window_bounds = array<i64: 8, 8, 4>}, {transform_indices = @transform_1, window_bounds = array<i64: 8, 8, 128>}, {pipeline_mode = #tpu.pipeline_mode<synchronous>, transform_indices = @transform_2, window_bounds = array<i64: 1, 128>}, {pipeline_mode = #tpu.pipeline_mode<synchronous>, transform_indices = @transform_3, window_bounds = array<i64: 4, 384>}, {pipeline_mode = #tpu.pipeline_mode<synchronous>, transform_indices = @transform_4, window_bounds = array<i64: 1, 384>}, {pipeline_mode = #tpu.pipeline_mode<synchronous>, transform_indices = @transform_5, window_bounds = array<i64: 128, 384>}, {pipeline_mode = #tpu.pipeline_mode<synchronous>, transform_indices = @transform_6, window_bounds = array<i64: 1, 128>}, {transform_indices = @transform_7, window_bounds = array<i64: 8, 8, 128>}]} {
    %c0_i32 = arith.constant 0 : i32
    %0 = arith.cmpi eq, %arg1, %c0_i32 : i32
    %1 = arith.extui %0 : i1 to i32
    %c0_i32_0 = arith.constant 0 : i32
    %2 = arith.cmpi ne, %1, %c0_i32_0 : i32
    scf.if %2 {
      %c0_157 = arith.constant 0 : index
      %c0_158 = arith.constant 0 : index
      %375 = vector.load %arg4[%c0_157, %c0_158] : memref<1x128xf32, #tpu.memory_space<vmem>>, vector<1x128xf32>
      %376 = vector.shape_cast %375 : vector<1x128xf32> to vector<1x128xf32>
      %377 = vector.broadcast %376 : vector<1x128xf32> to vector<8x128xf32>
      %c0_159 = arith.constant 0 : index
      %c0_160 = arith.constant 0 : index
      %378 = vector.load %arg11[%c0_159, %c0_160] : memref<8x128xf32, #tpu.memory_space<vmem>>, vector<8x128xf32>
      tpu.vector_store %arg11[%c0_159, %c0_160], %377 {strides = array<i32>} : memref<8x128xf32, #tpu.memory_space<vmem>>, vector<8x128xf32>,
    } else {
    }
    %c0 = arith.constant 0 : index
    %c0_1 = arith.constant 0 : index
    %c0_2 = arith.constant 0 : index
    %3 = vector.load %arg2[%c0, %c0_1, %c0_2] : memref<8x8x4xf32, #tpu.memory_space<vmem>>, vector<8x8x4xf32>
    %4 = vector.shape_cast %3 : vector<8x8x4xf32> to vector<64x4xf32>
    %c0_3 = arith.constant 0 : index
    %c0_4 = arith.constant 0 : index
    %5 = vector.load %arg5[%c0_3, %c0_4] : memref<4x384xf32, #tpu.memory_space<vmem>>, vector<4x384xf32>
    %cst = arith.constant dense<0.000000e+00> : vector<64x384xf32>
    %6 = tpu.matmul %4, %5, %cst {dimension_numbers = #tpu.dot_dimension_numbers<[1], [0], [0], [1], [0, 0, 1, 1], [], []>} : vector<64x4xf32>, vector<4x384xf32>, vector<64x384xf32> -> vector<64x384xf32>
    %7 = vector.shape_cast %6 : vector<64x384xf32> to vector<8x8x384xf32>
    %c0_5 = arith.constant 0 : index
    %c0_6 = arith.constant 0 : index
    %8 = vector.load %arg6[%c0_5, %c0_6] : memref<1x384xf32, #tpu.memory_space<vmem>>, vector<1x384xf32>
    %9 = vector.shape_cast %8 : vector<1x384xf32> to vector<1x1x384xf32>
    %10 = vector.broadcast %9 : vector<1x1x384xf32> to vector<8x8x384xf32>
    %11 = arith.addf %7, %10 : vector<8x8x384xf32>
    %c0_7 = arith.constant 0 : index
    %c0_8 = arith.constant 0 : index
    %c0_9 = arith.constant 0 : index
    %12 = vector.load %arg10[%c0_7, %c0_8, %c0_9] : memref<8x8x384xf32, #tpu.memory_space<vmem>>, vector<8x8x384xf32>
    tpu.vector_store %arg10[%c0_7, %c0_8, %c0_9], %11 {strides = array<i32>} : memref<8x8x384xf32, #tpu.memory_space<vmem>>, vector<8x8x384xf32>,
    %c0_10 = arith.constant 0 : index
    %c0_11 = arith.constant 0 : index
    %13 = vector.load %arg11[%c0_10, %c0_11] : memref<8x128xf32, #tpu.memory_space<vmem>>, vector<8x128xf32>
    %c0_i32_12 = arith.constant 0 : i32
    %c0_13 = arith.constant 0 : index
    %c0_14 = arith.constant 0 : index
    %14 = vector.load %arg7[%c0_13, %c0_14] : memref<128x384xf32, #tpu.memory_space<vmem>>, vector<128x384xf32>
    %cst_15 = arith.constant dense<0.000000e+00> : vector<8x384xf32>
    %15 = tpu.matmul %13, %14, %cst_15 {dimension_numbers = #tpu.dot_dimension_numbers<[1], [0], [0], [1], [0, 0, 1, 1], [], []>} : vector<8x128xf32>, vector<128x384xf32>, vector<8x384xf32> -> vector<8x384xf32>
    %16 = arith.index_cast %c0_i32_12 : i32 to index
    %c0_16 = arith.constant 0 : index
    %c0_17 = arith.constant 0 : index
    %17 = vector.load %arg10[%16, %c0_16, %c0_17] : memref<8x8x384xf32, #tpu.memory_space<vmem>>, vector<1x8x128xf32>
    %18 = vector.shape_cast %17 : vector<1x8x128xf32> to vector<8x128xf32>
    %19 = vector.extract_strided_slice %15 {offsets = [0, 0], sizes = [8, 128], strides = [1, 1]} : vector<8x384xf32> to vector<8x128xf32>
    %20 = arith.addf %18, %19 : vector<8x128xf32>
    %21 = arith.negf %20 : vector<8x128xf32>
    %22 = math.exp %21 : vector<8x128xf32>
    %cst_18 = arith.constant 1.000000e+00 : f32
    %23 = vector.broadcast %cst_18 : f32 to vector<8x128xf32>
    %24 = arith.addf %23, %22 : vector<8x128xf32>
    %25 = arith.divf %23, %24 : vector<8x128xf32>
    %26 = arith.index_cast %c0_i32_12 : i32 to index
    %c0_19 = arith.constant 0 : index
    %c128 = arith.constant 128 : index
    %27 = vector.load %arg10[%26, %c0_19, %c128] : memref<8x8x384xf32, #tpu.memory_space<vmem>>, vector<1x8x128xf32>
    %28 = vector.shape_cast %27 : vector<1x8x128xf32> to vector<8x128xf32>
    %29 = vector.extract_strided_slice %15 {offsets = [0, 128], sizes = [8, 128], strides = [1, 1]} : vector<8x384xf32> to vector<8x128xf32>
    %30 = arith.addf %28, %29 : vector<8x128xf32>
    %31 = arith.negf %30 : vector<8x128xf32>
    %32 = math.exp %31 : vector<8x128xf32>
    %cst_20 = arith.constant 1.000000e+00 : f32
    %33 = vector.broadcast %cst_20 : f32 to vector<8x128xf32>
    %34 = arith.addf %33, %32 : vector<8x128xf32>
    %35 = arith.divf %33, %34 : vector<8x128xf32>
    %36 = arith.index_cast %c0_i32_12 : i32 to index
    %c0_21 = arith.constant 0 : index
    %c256 = arith.constant 256 : index
    %37 = vector.load %arg10[%36, %c0_21, %c256] : memref<8x8x384xf32, #tpu.memory_space<vmem>>, vector<1x8x128xf32>
    %38 = vector.shape_cast %37 : vector<1x8x128xf32> to vector<8x128xf32>
    %39 = vector.extract_strided_slice %15 {offsets = [0, 256], sizes = [8, 128], strides = [1, 1]} : vector<8x384xf32> to vector<8x128xf32>
    %c0_22 = arith.constant 0 : index
    %c0_23 = arith.constant 0 : index
    %40 = vector.load %arg8[%c0_22, %c0_23] : memref<1x128xf32, #tpu.memory_space<vmem>>, vector<1x128xf32>
    %41 = vector.broadcast %40 : vector<1x128xf32> to vector<8x128xf32>
    %42 = arith.addf %39, %41 : vector<8x128xf32>
    %43 = arith.mulf %25, %42 : vector<8x128xf32>
    %44 = arith.addf %38, %43 : vector<8x128xf32>
    %45 = math.tanh %44 : vector<8x128xf32>
    %cst_24 = arith.constant 1.000000e+00 : f32
    %46 = vector.broadcast %cst_24 : f32 to vector<8x128xf32>
    %47 = arith.subf %46, %35 : vector<8x128xf32>
    %48 = arith.mulf %47, %45 : vector<8x128xf32>
    %49 = arith.mulf %35, %13 : vector<8x128xf32>
    %50 = arith.addf %48, %49 : vector<8x128xf32>
    %51 = arith.index_cast %c0_i32_12 : i32 to index
    %c0_25 = arith.constant 0 : index
    %c0_26 = arith.constant 0 : index
    %52 = vector.load %arg3[%51, %c0_25, %c0_26] : memref<8x8x128xf32, #tpu.memory_space<vmem>>, vector<1x8x128xf32>
    %53 = vector.shape_cast %52 : vector<1x8x128xf32> to vector<8x128xf32>
    %54 = arith.addf %50, %53 : vector<8x128xf32>
    %55 = arith.index_cast %c0_i32_12 : i32 to index
    %c0_27 = arith.constant 0 : index
    %c0_28 = arith.constant 0 : index
    %56 = vector.load %arg9[%55, %c0_27, %c0_28] : memref<8x8x128xf32, #tpu.memory_space<vmem>>, vector<1x8x128xf32>
    %57 = vector.shape_cast %56 : vector<1x8x128xf32> to vector<8x128xf32>
    %58 = vector.shape_cast %54 : vector<8x128xf32> to vector<1x8x128xf32>
    tpu.vector_store %arg9[%55, %c0_27, %c0_28], %58 {strides = array<i32>} : memref<8x8x128xf32, #tpu.memory_space<vmem>>, vector<1x8x128xf32>,
    %c1_i32 = arith.constant 1 : i32
    %c0_29 = arith.constant 0 : index
    %c0_30 = arith.constant 0 : index
    %59 = vector.load %arg7[%c0_29, %c0_30] : memref<128x384xf32, #tpu.memory_space<vmem>>, vector<128x384xf32>
    %cst_31 = arith.constant dense<0.000000e+00> : vector<8x384xf32>
    %60 = tpu.matmul %54, %59, %cst_31 {dimension_numbers = #tpu.dot_dimension_numbers<[1], [0], [0], [1], [0, 0, 1, 1], [], []>} : vector<8x128xf32>, vector<128x384xf32>, vector<8x384xf32> -> vector<8x384xf32>
    %61 = arith.index_cast %c1_i32 : i32 to index
    %c0_32 = arith.constant 0 : index
    %c0_33 = arith.constant 0 : index
    %62 = vector.load %arg10[%61, %c0_32, %c0_33] : memref<8x8x384xf32, #tpu.memory_space<vmem>>, vector<1x8x128xf32>
    %63 = vector.shape_cast %62 : vector<1x8x128xf32> to vector<8x128xf32>
    %64 = vector.extract_strided_slice %60 {offsets = [0, 0], sizes = [8, 128], strides = [1, 1]} : vector<8x384xf32> to vector<8x128xf32>
    %65 = arith.addf %63, %64 : vector<8x128xf32>
    %66 = arith.negf %65 : vector<8x128xf32>
    %67 = math.exp %66 : vector<8x128xf32>
    %cst_34 = arith.constant 1.000000e+00 : f32
    %68 = vector.broadcast %cst_34 : f32 to vector<8x128xf32>
    %69 = arith.addf %68, %67 : vector<8x128xf32>
    %70 = arith.divf %68, %69 : vector<8x128xf32>
    %71 = arith.index_cast %c1_i32 : i32 to index
    %c0_35 = arith.constant 0 : index
    %c128_36 = arith.constant 128 : index
    %72 = vector.load %arg10[%71, %c0_35, %c128_36] : memref<8x8x384xf32, #tpu.memory_space<vmem>>, vector<1x8x128xf32>
    %73 = vector.shape_cast %72 : vector<1x8x128xf32> to vector<8x128xf32>
    %74 = vector.extract_strided_slice %60 {offsets = [0, 128], sizes = [8, 128], strides = [1, 1]} : vector<8x384xf32> to vector<8x128xf32>
    %75 = arith.addf %73, %74 : vector<8x128xf32>
    %76 = arith.negf %75 : vector<8x128xf32>
    %77 = math.exp %76 : vector<8x128xf32>
    %cst_37 = arith.constant 1.000000e+00 : f32
    %78 = vector.broadcast %cst_37 : f32 to vector<8x128xf32>
    %79 = arith.addf %78, %77 : vector<8x128xf32>
    %80 = arith.divf %78, %79 : vector<8x128xf32>
    %81 = arith.index_cast %c1_i32 : i32 to index
    %c0_38 = arith.constant 0 : index
    %c256_39 = arith.constant 256 : index
    %82 = vector.load %arg10[%81, %c0_38, %c256_39] : memref<8x8x384xf32, #tpu.memory_space<vmem>>, vector<1x8x128xf32>
    %83 = vector.shape_cast %82 : vector<1x8x128xf32> to vector<8x128xf32>
    %84 = vector.extract_strided_slice %60 {offsets = [0, 256], sizes = [8, 128], strides = [1, 1]} : vector<8x384xf32> to vector<8x128xf32>
    %c0_40 = arith.constant 0 : index
    %c0_41 = arith.constant 0 : index
    %85 = vector.load %arg8[%c0_40, %c0_41] : memref<1x128xf32, #tpu.memory_space<vmem>>, vector<1x128xf32>
    %86 = vector.broadcast %85 : vector<1x128xf32> to vector<8x128xf32>
    %87 = arith.addf %84, %86 : vector<8x128xf32>
    %88 = arith.mulf %70, %87 : vector<8x128xf32>
    %89 = arith.addf %83, %88 : vector<8x128xf32>
    %90 = math.tanh %89 : vector<8x128xf32>
    %cst_42 = arith.constant 1.000000e+00 : f32
    %91 = vector.broadcast %cst_42 : f32 to vector<8x128xf32>
    %92 = arith.subf %91, %80 : vector<8x128xf32>
    %93 = arith.mulf %92, %90 : vector<8x128xf32>
    %94 = arith.mulf %80, %54 : vector<8x128xf32>
    %95 = arith.addf %93, %94 : vector<8x128xf32>
    %96 = arith.index_cast %c1_i32 : i32 to index
    %c0_43 = arith.constant 0 : index
    %c0_44 = arith.constant 0 : index
    %97 = vector.load %arg3[%96, %c0_43, %c0_44] : memref<8x8x128xf32, #tpu.memory_space<vmem>>, vector<1x8x128xf32>
    %98 = vector.shape_cast %97 : vector<1x8x128xf32> to vector<8x128xf32>
    %99 = arith.addf %95, %98 : vector<8x128xf32>
    %100 = arith.index_cast %c1_i32 : i32 to index
    %c0_45 = arith.constant 0 : index
    %c0_46 = arith.constant 0 : index
    %101 = vector.load %arg9[%100, %c0_45, %c0_46] : memref<8x8x128xf32, #tpu.memory_space<vmem>>, vector<1x8x128xf32>
    %102 = vector.shape_cast %101 : vector<1x8x128xf32> to vector<8x128xf32>
    %103 = vector.shape_cast %99 : vector<8x128xf32> to vector<1x8x128xf32>
    tpu.vector_store %arg9[%100, %c0_45, %c0_46], %103 {strides = array<i32>} : memref<8x8x128xf32, #tpu.memory_space<vmem>>, vector<1x8x128xf32>,
    %c2_i32 = arith.constant 2 : i32
    %c0_47 = arith.constant 0 : index
    %c0_48 = arith.constant 0 : index
    %104 = vector.load %arg7[%c0_47, %c0_48] : memref<128x384xf32, #tpu.memory_space<vmem>>, vector<128x384xf32>
    %cst_49 = arith.constant dense<0.000000e+00> : vector<8x384xf32>
    %105 = tpu.matmul %99, %104, %cst_49 {dimension_numbers = #tpu.dot_dimension_numbers<[1], [0], [0], [1], [0, 0, 1, 1], [], []>} : vector<8x128xf32>, vector<128x384xf32>, vector<8x384xf32> -> vector<8x384xf32>
    %106 = arith.index_cast %c2_i32 : i32 to index
    %c0_50 = arith.constant 0 : index
    %c0_51 = arith.constant 0 : index
    %107 = vector.load %arg10[%106, %c0_50, %c0_51] : memref<8x8x384xf32, #tpu.memory_space<vmem>>, vector<1x8x128xf32>
    %108 = vector.shape_cast %107 : vector<1x8x128xf32> to vector<8x128xf32>
    %109 = vector.extract_strided_slice %105 {offsets = [0, 0], sizes = [8, 128], strides = [1, 1]} : vector<8x384xf32> to vector<8x128xf32>
    %110 = arith.addf %108, %109 : vector<8x128xf32>
    %111 = arith.negf %110 : vector<8x128xf32>
    %112 = math.exp %111 : vector<8x128xf32>
    %cst_52 = arith.constant 1.000000e+00 : f32
    %113 = vector.broadcast %cst_52 : f32 to vector<8x128xf32>
    %114 = arith.addf %113, %112 : vector<8x128xf32>
    %115 = arith.divf %113, %114 : vector<8x128xf32>
    %116 = arith.index_cast %c2_i32 : i32 to index
    %c0_53 = arith.constant 0 : index
    %c128_54 = arith.constant 128 : index
    %117 = vector.load %arg10[%116, %c0_53, %c128_54] : memref<8x8x384xf32, #tpu.memory_space<vmem>>, vector<1x8x128xf32>
    %118 = vector.shape_cast %117 : vector<1x8x128xf32> to vector<8x128xf32>
    %119 = vector.extract_strided_slice %105 {offsets = [0, 128], sizes = [8, 128], strides = [1, 1]} : vector<8x384xf32> to vector<8x128xf32>
    %120 = arith.addf %118, %119 : vector<8x128xf32>
    %121 = arith.negf %120 : vector<8x128xf32>
    %122 = math.exp %121 : vector<8x128xf32>
    %cst_55 = arith.constant 1.000000e+00 : f32
    %123 = vector.broadcast %cst_55 : f32 to vector<8x128xf32>
    %124 = arith.addf %123, %122 : vector<8x128xf32>
    %125 = arith.divf %123, %124 : vector<8x128xf32>
    %126 = arith.index_cast %c2_i32 : i32 to index
    %c0_56 = arith.constant 0 : index
    %c256_57 = arith.constant 256 : index
    %127 = vector.load %arg10[%126, %c0_56, %c256_57] : memref<8x8x384xf32, #tpu.memory_space<vmem>>, vector<1x8x128xf32>
    %128 = vector.shape_cast %127 : vector<1x8x128xf32> to vector<8x128xf32>
    %129 = vector.extract_strided_slice %105 {offsets = [0, 256], sizes = [8, 128], strides = [1, 1]} : vector<8x384xf32> to vector<8x128xf32>
    %c0_58 = arith.constant 0 : index
    %c0_59 = arith.constant 0 : index
    %130 = vector.load %arg8[%c0_58, %c0_59] : memref<1x128xf32, #tpu.memory_space<vmem>>, vector<1x128xf32>
    %131 = vector.broadcast %130 : vector<1x128xf32> to vector<8x128xf32>
    %132 = arith.addf %129, %131 : vector<8x128xf32>
    %133 = arith.mulf %115, %132 : vector<8x128xf32>
    %134 = arith.addf %128, %133 : vector<8x128xf32>
    %135 = math.tanh %134 : vector<8x128xf32>
    %cst_60 = arith.constant 1.000000e+00 : f32
    %136 = vector.broadcast %cst_60 : f32 to vector<8x128xf32>
    %137 = arith.subf %136, %125 : vector<8x128xf32>
    %138 = arith.mulf %137, %135 : vector<8x128xf32>
    %139 = arith.mulf %125, %99 : vector<8x128xf32>
    %140 = arith.addf %138, %139 : vector<8x128xf32>
    %141 = arith.index_cast %c2_i32 : i32 to index
    %c0_61 = arith.constant 0 : index
    %c0_62 = arith.constant 0 : index
    %142 = vector.load %arg3[%141, %c0_61, %c0_62] : memref<8x8x128xf32, #tpu.memory_space<vmem>>, vector<1x8x128xf32>
    %143 = vector.shape_cast %142 : vector<1x8x128xf32> to vector<8x128xf32>
    %144 = arith.addf %140, %143 : vector<8x128xf32>
    %145 = arith.index_cast %c2_i32 : i32 to index
    %c0_63 = arith.constant 0 : index
    %c0_64 = arith.constant 0 : index
    %146 = vector.load %arg9[%145, %c0_63, %c0_64] : memref<8x8x128xf32, #tpu.memory_space<vmem>>, vector<1x8x128xf32>
    %147 = vector.shape_cast %146 : vector<1x8x128xf32> to vector<8x128xf32>
    %148 = vector.shape_cast %144 : vector<8x128xf32> to vector<1x8x128xf32>
    tpu.vector_store %arg9[%145, %c0_63, %c0_64], %148 {strides = array<i32>} : memref<8x8x128xf32, #tpu.memory_space<vmem>>, vector<1x8x128xf32>,
    %c3_i32 = arith.constant 3 : i32
    %c0_65 = arith.constant 0 : index
    %c0_66 = arith.constant 0 : index
    %149 = vector.load %arg7[%c0_65, %c0_66] : memref<128x384xf32, #tpu.memory_space<vmem>>, vector<128x384xf32>
    %cst_67 = arith.constant dense<0.000000e+00> : vector<8x384xf32>
    %150 = tpu.matmul %144, %149, %cst_67 {dimension_numbers = #tpu.dot_dimension_numbers<[1], [0], [0], [1], [0, 0, 1, 1], [], []>} : vector<8x128xf32>, vector<128x384xf32>, vector<8x384xf32> -> vector<8x384xf32>
    %151 = arith.index_cast %c3_i32 : i32 to index
    %c0_68 = arith.constant 0 : index
    %c0_69 = arith.constant 0 : index
    %152 = vector.load %arg10[%151, %c0_68, %c0_69] : memref<8x8x384xf32, #tpu.memory_space<vmem>>, vector<1x8x128xf32>
    %153 = vector.shape_cast %152 : vector<1x8x128xf32> to vector<8x128xf32>
    %154 = vector.extract_strided_slice %150 {offsets = [0, 0], sizes = [8, 128], strides = [1, 1]} : vector<8x384xf32> to vector<8x128xf32>
    %155 = arith.addf %153, %154 : vector<8x128xf32>
    %156 = arith.negf %155 : vector<8x128xf32>
    %157 = math.exp %156 : vector<8x128xf32>
    %cst_70 = arith.constant 1.000000e+00 : f32
    %158 = vector.broadcast %cst_70 : f32 to vector<8x128xf32>
    %159 = arith.addf %158, %157 : vector<8x128xf32>
    %160 = arith.divf %158, %159 : vector<8x128xf32>
    %161 = arith.index_cast %c3_i32 : i32 to index
    %c0_71 = arith.constant 0 : index
    %c128_72 = arith.constant 128 : index
    %162 = vector.load %arg10[%161, %c0_71, %c128_72] : memref<8x8x384xf32, #tpu.memory_space<vmem>>, vector<1x8x128xf32>
    %163 = vector.shape_cast %162 : vector<1x8x128xf32> to vector<8x128xf32>
    %164 = vector.extract_strided_slice %150 {offsets = [0, 128], sizes = [8, 128], strides = [1, 1]} : vector<8x384xf32> to vector<8x128xf32>
    %165 = arith.addf %163, %164 : vector<8x128xf32>
    %166 = arith.negf %165 : vector<8x128xf32>
    %167 = math.exp %166 : vector<8x128xf32>
    %cst_73 = arith.constant 1.000000e+00 : f32
    %168 = vector.broadcast %cst_73 : f32 to vector<8x128xf32>
    %169 = arith.addf %168, %167 : vector<8x128xf32>
    %170 = arith.divf %168, %169 : vector<8x128xf32>
    %171 = arith.index_cast %c3_i32 : i32 to index
    %c0_74 = arith.constant 0 : index
    %c256_75 = arith.constant 256 : index
    %172 = vector.load %arg10[%171, %c0_74, %c256_75] : memref<8x8x384xf32, #tpu.memory_space<vmem>>, vector<1x8x128xf32>
    %173 = vector.shape_cast %172 : vector<1x8x128xf32> to vector<8x128xf32>
    %174 = vector.extract_strided_slice %150 {offsets = [0, 256], sizes = [8, 128], strides = [1, 1]} : vector<8x384xf32> to vector<8x128xf32>
    %c0_76 = arith.constant 0 : index
    %c0_77 = arith.constant 0 : index
    %175 = vector.load %arg8[%c0_76, %c0_77] : memref<1x128xf32, #tpu.memory_space<vmem>>, vector<1x128xf32>
    %176 = vector.broadcast %175 : vector<1x128xf32> to vector<8x128xf32>
    %177 = arith.addf %174, %176 : vector<8x128xf32>
    %178 = arith.mulf %160, %177 : vector<8x128xf32>
    %179 = arith.addf %173, %178 : vector<8x128xf32>
    %180 = math.tanh %179 : vector<8x128xf32>
    %cst_78 = arith.constant 1.000000e+00 : f32
    %181 = vector.broadcast %cst_78 : f32 to vector<8x128xf32>
    %182 = arith.subf %181, %170 : vector<8x128xf32>
    %183 = arith.mulf %182, %180 : vector<8x128xf32>
    %184 = arith.mulf %170, %144 : vector<8x128xf32>
    %185 = arith.addf %183, %184 : vector<8x128xf32>
    %186 = arith.index_cast %c3_i32 : i32 to index
    %c0_79 = arith.constant 0 : index
    %c0_80 = arith.constant 0 : index
    %187 = vector.load %arg3[%186, %c0_79, %c0_80] : memref<8x8x128xf32, #tpu.memory_space<vmem>>, vector<1x8x128xf32>
    %188 = vector.shape_cast %187 : vector<1x8x128xf32> to vector<8x128xf32>
    %189 = arith.addf %185, %188 : vector<8x128xf32>
    %190 = arith.index_cast %c3_i32 : i32 to index
    %c0_81 = arith.constant 0 : index
    %c0_82 = arith.constant 0 : index
    %191 = vector.load %arg9[%190, %c0_81, %c0_82] : memref<8x8x128xf32, #tpu.memory_space<vmem>>, vector<1x8x128xf32>
    %192 = vector.shape_cast %191 : vector<1x8x128xf32> to vector<8x128xf32>
    %193 = vector.shape_cast %189 : vector<8x128xf32> to vector<1x8x128xf32>
    tpu.vector_store %arg9[%190, %c0_81, %c0_82], %193 {strides = array<i32>} : memref<8x8x128xf32, #tpu.memory_space<vmem>>, vector<1x8x128xf32>,
    %c4_i32 = arith.constant 4 : i32
    %c0_83 = arith.constant 0 : index
    %c0_84 = arith.constant 0 : index
    %194 = vector.load %arg7[%c0_83, %c0_84] : memref<128x384xf32, #tpu.memory_space<vmem>>, vector<128x384xf32>
    %cst_85 = arith.constant dense<0.000000e+00> : vector<8x384xf32>
    %195 = tpu.matmul %189, %194, %cst_85 {dimension_numbers = #tpu.dot_dimension_numbers<[1], [0], [0], [1], [0, 0, 1, 1], [], []>} : vector<8x128xf32>, vector<128x384xf32>, vector<8x384xf32> -> vector<8x384xf32>
    %196 = arith.index_cast %c4_i32 : i32 to index
    %c0_86 = arith.constant 0 : index
    %c0_87 = arith.constant 0 : index
    %197 = vector.load %arg10[%196, %c0_86, %c0_87] : memref<8x8x384xf32, #tpu.memory_space<vmem>>, vector<1x8x128xf32>
    %198 = vector.shape_cast %197 : vector<1x8x128xf32> to vector<8x128xf32>
    %199 = vector.extract_strided_slice %195 {offsets = [0, 0], sizes = [8, 128], strides = [1, 1]} : vector<8x384xf32> to vector<8x128xf32>
    %200 = arith.addf %198, %199 : vector<8x128xf32>
    %201 = arith.negf %200 : vector<8x128xf32>
    %202 = math.exp %201 : vector<8x128xf32>
    %cst_88 = arith.constant 1.000000e+00 : f32
    %203 = vector.broadcast %cst_88 : f32 to vector<8x128xf32>
    %204 = arith.addf %203, %202 : vector<8x128xf32>
    %205 = arith.divf %203, %204 : vector<8x128xf32>
    %206 = arith.index_cast %c4_i32 : i32 to index
    %c0_89 = arith.constant 0 : index
    %c128_90 = arith.constant 128 : index
    %207 = vector.load %arg10[%206, %c0_89, %c128_90] : memref<8x8x384xf32, #tpu.memory_space<vmem>>, vector<1x8x128xf32>
    %208 = vector.shape_cast %207 : vector<1x8x128xf32> to vector<8x128xf32>
    %209 = vector.extract_strided_slice %195 {offsets = [0, 128], sizes = [8, 128], strides = [1, 1]} : vector<8x384xf32> to vector<8x128xf32>
    %210 = arith.addf %208, %209 : vector<8x128xf32>
    %211 = arith.negf %210 : vector<8x128xf32>
    %212 = math.exp %211 : vector<8x128xf32>
    %cst_91 = arith.constant 1.000000e+00 : f32
    %213 = vector.broadcast %cst_91 : f32 to vector<8x128xf32>
    %214 = arith.addf %213, %212 : vector<8x128xf32>
    %215 = arith.divf %213, %214 : vector<8x128xf32>
    %216 = arith.index_cast %c4_i32 : i32 to index
    %c0_92 = arith.constant 0 : index
    %c256_93 = arith.constant 256 : index
    %217 = vector.load %arg10[%216, %c0_92, %c256_93] : memref<8x8x384xf32, #tpu.memory_space<vmem>>, vector<1x8x128xf32>
    %218 = vector.shape_cast %217 : vector<1x8x128xf32> to vector<8x128xf32>
    %219 = vector.extract_strided_slice %195 {offsets = [0, 256], sizes = [8, 128], strides = [1, 1]} : vector<8x384xf32> to vector<8x128xf32>
    %c0_94 = arith.constant 0 : index
    %c0_95 = arith.constant 0 : index
    %220 = vector.load %arg8[%c0_94, %c0_95] : memref<1x128xf32, #tpu.memory_space<vmem>>, vector<1x128xf32>
    %221 = vector.broadcast %220 : vector<1x128xf32> to vector<8x128xf32>
    %222 = arith.addf %219, %221 : vector<8x128xf32>
    %223 = arith.mulf %205, %222 : vector<8x128xf32>
    %224 = arith.addf %218, %223 : vector<8x128xf32>
    %225 = math.tanh %224 : vector<8x128xf32>
    %cst_96 = arith.constant 1.000000e+00 : f32
    %226 = vector.broadcast %cst_96 : f32 to vector<8x128xf32>
    %227 = arith.subf %226, %215 : vector<8x128xf32>
    %228 = arith.mulf %227, %225 : vector<8x128xf32>
    %229 = arith.mulf %215, %189 : vector<8x128xf32>
    %230 = arith.addf %228, %229 : vector<8x128xf32>
    %231 = arith.index_cast %c4_i32 : i32 to index
    %c0_97 = arith.constant 0 : index
    %c0_98 = arith.constant 0 : index
    %232 = vector.load %arg3[%231, %c0_97, %c0_98] : memref<8x8x128xf32, #tpu.memory_space<vmem>>, vector<1x8x128xf32>
    %233 = vector.shape_cast %232 : vector<1x8x128xf32> to vector<8x128xf32>
    %234 = arith.addf %230, %233 : vector<8x128xf32>
    %235 = arith.index_cast %c4_i32 : i32 to index
    %c0_99 = arith.constant 0 : index
    %c0_100 = arith.constant 0 : index
    %236 = vector.load %arg9[%235, %c0_99, %c0_100] : memref<8x8x128xf32, #tpu.memory_space<vmem>>, vector<1x8x128xf32>
    %237 = vector.shape_cast %236 : vector<1x8x128xf32> to vector<8x128xf32>
    %238 = vector.shape_cast %234 : vector<8x128xf32> to vector<1x8x128xf32>
    tpu.vector_store %arg9[%235, %c0_99, %c0_100], %238 {strides = array<i32>} : memref<8x8x128xf32, #tpu.memory_space<vmem>>, vector<1x8x128xf32>,
    %c5_i32 = arith.constant 5 : i32
    %c0_101 = arith.constant 0 : index
    %c0_102 = arith.constant 0 : index
    %239 = vector.load %arg7[%c0_101, %c0_102] : memref<128x384xf32, #tpu.memory_space<vmem>>, vector<128x384xf32>
    %cst_103 = arith.constant dense<0.000000e+00> : vector<8x384xf32>
    %240 = tpu.matmul %234, %239, %cst_103 {dimension_numbers = #tpu.dot_dimension_numbers<[1], [0], [0], [1], [0, 0, 1, 1], [], []>} : vector<8x128xf32>, vector<128x384xf32>, vector<8x384xf32> -> vector<8x384xf32>
    %241 = arith.index_cast %c5_i32 : i32 to index
    %c0_104 = arith.constant 0 : index
    %c0_105 = arith.constant 0 : index
    %242 = vector.load %arg10[%241, %c0_104, %c0_105] : memref<8x8x384xf32, #tpu.memory_space<vmem>>, vector<1x8x128xf32>
    %243 = vector.shape_cast %242 : vector<1x8x128xf32> to vector<8x128xf32>
    %244 = vector.extract_strided_slice %240 {offsets = [0, 0], sizes = [8, 128], strides = [1, 1]} : vector<8x384xf32> to vector<8x128xf32>
    %245 = arith.addf %243, %244 : vector<8x128xf32>
    %246 = arith.negf %245 : vector<8x128xf32>
    %247 = math.exp %246 : vector<8x128xf32>
    %cst_106 = arith.constant 1.000000e+00 : f32
    %248 = vector.broadcast %cst_106 : f32 to vector<8x128xf32>
    %249 = arith.addf %248, %247 : vector<8x128xf32>
    %250 = arith.divf %248, %249 : vector<8x128xf32>
    %251 = arith.index_cast %c5_i32 : i32 to index
    %c0_107 = arith.constant 0 : index
    %c128_108 = arith.constant 128 : index
    %252 = vector.load %arg10[%251, %c0_107, %c128_108] : memref<8x8x384xf32, #tpu.memory_space<vmem>>, vector<1x8x128xf32>
    %253 = vector.shape_cast %252 : vector<1x8x128xf32> to vector<8x128xf32>
    %254 = vector.extract_strided_slice %240 {offsets = [0, 128], sizes = [8, 128], strides = [1, 1]} : vector<8x384xf32> to vector<8x128xf32>
    %255 = arith.addf %253, %254 : vector<8x128xf32>
    %256 = arith.negf %255 : vector<8x128xf32>
    %257 = math.exp %256 : vector<8x128xf32>
    %cst_109 = arith.constant 1.000000e+00 : f32
    %258 = vector.broadcast %cst_109 : f32 to vector<8x128xf32>
    %259 = arith.addf %258, %257 : vector<8x128xf32>
    %260 = arith.divf %258, %259 : vector<8x128xf32>
    %261 = arith.index_cast %c5_i32 : i32 to index
    %c0_110 = arith.constant 0 : index
    %c256_111 = arith.constant 256 : index
    %262 = vector.load %arg10[%261, %c0_110, %c256_111] : memref<8x8x384xf32, #tpu.memory_space<vmem>>, vector<1x8x128xf32>
    %263 = vector.shape_cast %262 : vector<1x8x128xf32> to vector<8x128xf32>
    %264 = vector.extract_strided_slice %240 {offsets = [0, 256], sizes = [8, 128], strides = [1, 1]} : vector<8x384xf32> to vector<8x128xf32>
    %c0_112 = arith.constant 0 : index
    %c0_113 = arith.constant 0 : index
    %265 = vector.load %arg8[%c0_112, %c0_113] : memref<1x128xf32, #tpu.memory_space<vmem>>, vector<1x128xf32>
    %266 = vector.broadcast %265 : vector<1x128xf32> to vector<8x128xf32>
    %267 = arith.addf %264, %266 : vector<8x128xf32>
    %268 = arith.mulf %250, %267 : vector<8x128xf32>
    %269 = arith.addf %263, %268 : vector<8x128xf32>
    %270 = math.tanh %269 : vector<8x128xf32>
    %cst_114 = arith.constant 1.000000e+00 : f32
    %271 = vector.broadcast %cst_114 : f32 to vector<8x128xf32>
    %272 = arith.subf %271, %260 : vector<8x128xf32>
    %273 = arith.mulf %272, %270 : vector<8x128xf32>
    %274 = arith.mulf %260, %234 : vector<8x128xf32>
    %275 = arith.addf %273, %274 : vector<8x128xf32>
    %276 = arith.index_cast %c5_i32 : i32 to index
    %c0_115 = arith.constant 0 : index
    %c0_116 = arith.constant 0 : index
    %277 = vector.load %arg3[%276, %c0_115, %c0_116] : memref<8x8x128xf32, #tpu.memory_space<vmem>>, vector<1x8x128xf32>
    %278 = vector.shape_cast %277 : vector<1x8x128xf32> to vector<8x128xf32>
    %279 = arith.addf %275, %278 : vector<8x128xf32>
    %280 = arith.index_cast %c5_i32 : i32 to index
    %c0_117 = arith.constant 0 : index
    %c0_118 = arith.constant 0 : index
    %281 = vector.load %arg9[%280, %c0_117, %c0_118] : memref<8x8x128xf32, #tpu.memory_space<vmem>>, vector<1x8x128xf32>
    %282 = vector.shape_cast %281 : vector<1x8x128xf32> to vector<8x128xf32>
    %283 = vector.shape_cast %279 : vector<8x128xf32> to vector<1x8x128xf32>
    tpu.vector_store %arg9[%280, %c0_117, %c0_118], %283 {strides = array<i32>} : memref<8x8x128xf32, #tpu.memory_space<vmem>>, vector<1x8x128xf32>,
    %c6_i32 = arith.constant 6 : i32
    %c0_119 = arith.constant 0 : index
    %c0_120 = arith.constant 0 : index
    %284 = vector.load %arg7[%c0_119, %c0_120] : memref<128x384xf32, #tpu.memory_space<vmem>>, vector<128x384xf32>
    %cst_121 = arith.constant dense<0.000000e+00> : vector<8x384xf32>
    %285 = tpu.matmul %279, %284, %cst_121 {dimension_numbers = #tpu.dot_dimension_numbers<[1], [0], [0], [1], [0, 0, 1, 1], [], []>} : vector<8x128xf32>, vector<128x384xf32>, vector<8x384xf32> -> vector<8x384xf32>
    %286 = arith.index_cast %c6_i32 : i32 to index
    %c0_122 = arith.constant 0 : index
    %c0_123 = arith.constant 0 : index
    %287 = vector.load %arg10[%286, %c0_122, %c0_123] : memref<8x8x384xf32, #tpu.memory_space<vmem>>, vector<1x8x128xf32>
    %288 = vector.shape_cast %287 : vector<1x8x128xf32> to vector<8x128xf32>
    %289 = vector.extract_strided_slice %285 {offsets = [0, 0], sizes = [8, 128], strides = [1, 1]} : vector<8x384xf32> to vector<8x128xf32>
    %290 = arith.addf %288, %289 : vector<8x128xf32>
    %291 = arith.negf %290 : vector<8x128xf32>
    %292 = math.exp %291 : vector<8x128xf32>
    %cst_124 = arith.constant 1.000000e+00 : f32
    %293 = vector.broadcast %cst_124 : f32 to vector<8x128xf32>
    %294 = arith.addf %293, %292 : vector<8x128xf32>
    %295 = arith.divf %293, %294 : vector<8x128xf32>
    %296 = arith.index_cast %c6_i32 : i32 to index
    %c0_125 = arith.constant 0 : index
    %c128_126 = arith.constant 128 : index
    %297 = vector.load %arg10[%296, %c0_125, %c128_126] : memref<8x8x384xf32, #tpu.memory_space<vmem>>, vector<1x8x128xf32>
    %298 = vector.shape_cast %297 : vector<1x8x128xf32> to vector<8x128xf32>
    %299 = vector.extract_strided_slice %285 {offsets = [0, 128], sizes = [8, 128], strides = [1, 1]} : vector<8x384xf32> to vector<8x128xf32>
    %300 = arith.addf %298, %299 : vector<8x128xf32>
    %301 = arith.negf %300 : vector<8x128xf32>
    %302 = math.exp %301 : vector<8x128xf32>
    %cst_127 = arith.constant 1.000000e+00 : f32
    %303 = vector.broadcast %cst_127 : f32 to vector<8x128xf32>
    %304 = arith.addf %303, %302 : vector<8x128xf32>
    %305 = arith.divf %303, %304 : vector<8x128xf32>
    %306 = arith.index_cast %c6_i32 : i32 to index
    %c0_128 = arith.constant 0 : index
    %c256_129 = arith.constant 256 : index
    %307 = vector.load %arg10[%306, %c0_128, %c256_129] : memref<8x8x384xf32, #tpu.memory_space<vmem>>, vector<1x8x128xf32>
    %308 = vector.shape_cast %307 : vector<1x8x128xf32> to vector<8x128xf32>
    %309 = vector.extract_strided_slice %285 {offsets = [0, 256], sizes = [8, 128], strides = [1, 1]} : vector<8x384xf32> to vector<8x128xf32>
    %c0_130 = arith.constant 0 : index
    %c0_131 = arith.constant 0 : index
    %310 = vector.load %arg8[%c0_130, %c0_131] : memref<1x128xf32, #tpu.memory_space<vmem>>, vector<1x128xf32>
    %311 = vector.broadcast %310 : vector<1x128xf32> to vector<8x128xf32>
    %312 = arith.addf %309, %311 : vector<8x128xf32>
    %313 = arith.mulf %295, %312 : vector<8x128xf32>
    %314 = arith.addf %308, %313 : vector<8x128xf32>
    %315 = math.tanh %314 : vector<8x128xf32>
    %cst_132 = arith.constant 1.000000e+00 : f32
    %316 = vector.broadcast %cst_132 : f32 to vector<8x128xf32>
    %317 = arith.subf %316, %305 : vector<8x128xf32>
    %318 = arith.mulf %317, %315 : vector<8x128xf32>
    %319 = arith.mulf %305, %279 : vector<8x128xf32>
    %320 = arith.addf %318, %319 : vector<8x128xf32>
    %321 = arith.index_cast %c6_i32 : i32 to index
    %c0_133 = arith.constant 0 : index
    %c0_134 = arith.constant 0 : index
    %322 = vector.load %arg3[%321, %c0_133, %c0_134] : memref<8x8x128xf32, #tpu.memory_space<vmem>>, vector<1x8x128xf32>
    %323 = vector.shape_cast %322 : vector<1x8x128xf32> to vector<8x128xf32>
    %324 = arith.addf %320, %323 : vector<8x128xf32>
    %325 = arith.index_cast %c6_i32 : i32 to index
    %c0_135 = arith.constant 0 : index
    %c0_136 = arith.constant 0 : index
    %326 = vector.load %arg9[%325, %c0_135, %c0_136] : memref<8x8x128xf32, #tpu.memory_space<vmem>>, vector<1x8x128xf32>
    %327 = vector.shape_cast %326 : vector<1x8x128xf32> to vector<8x128xf32>
    %328 = vector.shape_cast %324 : vector<8x128xf32> to vector<1x8x128xf32>
    tpu.vector_store %arg9[%325, %c0_135, %c0_136], %328 {strides = array<i32>} : memref<8x8x128xf32, #tpu.memory_space<vmem>>, vector<1x8x128xf32>,
    %c7_i32 = arith.constant 7 : i32
    %c0_137 = arith.constant 0 : index
    %c0_138 = arith.constant 0 : index
    %329 = vector.load %arg7[%c0_137, %c0_138] : memref<128x384xf32, #tpu.memory_space<vmem>>, vector<128x384xf32>
    %cst_139 = arith.constant dense<0.000000e+00> : vector<8x384xf32>
    %330 = tpu.matmul %324, %329, %cst_139 {dimension_numbers = #tpu.dot_dimension_numbers<[1], [0], [0], [1], [0, 0, 1, 1], [], []>} : vector<8x128xf32>, vector<128x384xf32>, vector<8x384xf32> -> vector<8x384xf32>
    %331 = arith.index_cast %c7_i32 : i32 to index
    %c0_140 = arith.constant 0 : index
    %c0_141 = arith.constant 0 : index
    %332 = vector.load %arg10[%331, %c0_140, %c0_141] : memref<8x8x384xf32, #tpu.memory_space<vmem>>, vector<1x8x128xf32>
    %333 = vector.shape_cast %332 : vector<1x8x128xf32> to vector<8x128xf32>
    %334 = vector.extract_strided_slice %330 {offsets = [0, 0], sizes = [8, 128], strides = [1, 1]} : vector<8x384xf32> to vector<8x128xf32>
    %335 = arith.addf %333, %334 : vector<8x128xf32>
    %336 = arith.negf %335 : vector<8x128xf32>
    %337 = math.exp %336 : vector<8x128xf32>
    %cst_142 = arith.constant 1.000000e+00 : f32
    %338 = vector.broadcast %cst_142 : f32 to vector<8x128xf32>
    %339 = arith.addf %338, %337 : vector<8x128xf32>
    %340 = arith.divf %338, %339 : vector<8x128xf32>
    %341 = arith.index_cast %c7_i32 : i32 to index
    %c0_143 = arith.constant 0 : index
    %c128_144 = arith.constant 128 : index
    %342 = vector.load %arg10[%341, %c0_143, %c128_144] : memref<8x8x384xf32, #tpu.memory_space<vmem>>, vector<1x8x128xf32>
    %343 = vector.shape_cast %342 : vector<1x8x128xf32> to vector<8x128xf32>
    %344 = vector.extract_strided_slice %330 {offsets = [0, 128], sizes = [8, 128], strides = [1, 1]} : vector<8x384xf32> to vector<8x128xf32>
    %345 = arith.addf %343, %344 : vector<8x128xf32>
    %346 = arith.negf %345 : vector<8x128xf32>
    %347 = math.exp %346 : vector<8x128xf32>
    %cst_145 = arith.constant 1.000000e+00 : f32
    %348 = vector.broadcast %cst_145 : f32 to vector<8x128xf32>
    %349 = arith.addf %348, %347 : vector<8x128xf32>
    %350 = arith.divf %348, %349 : vector<8x128xf32>
    %351 = arith.index_cast %c7_i32 : i32 to index
    %c0_146 = arith.constant 0 : index
    %c256_147 = arith.constant 256 : index
    %352 = vector.load %arg10[%351, %c0_146, %c256_147] : memref<8x8x384xf32, #tpu.memory_space<vmem>>, vector<1x8x128xf32>
    %353 = vector.shape_cast %352 : vector<1x8x128xf32> to vector<8x128xf32>
    %354 = vector.extract_strided_slice %330 {offsets = [0, 256], sizes = [8, 128], strides = [1, 1]} : vector<8x384xf32> to vector<8x128xf32>
    %c0_148 = arith.constant 0 : index
    %c0_149 = arith.constant 0 : index
    %355 = vector.load %arg8[%c0_148, %c0_149] : memref<1x128xf32, #tpu.memory_space<vmem>>, vector<1x128xf32>
    %356 = vector.broadcast %355 : vector<1x128xf32> to vector<8x128xf32>
    %357 = arith.addf %354, %356 : vector<8x128xf32>
    %358 = arith.mulf %340, %357 : vector<8x128xf32>
    %359 = arith.addf %353, %358 : vector<8x128xf32>
    %360 = math.tanh %359 : vector<8x128xf32>
    %cst_150 = arith.constant 1.000000e+00 : f32
    %361 = vector.broadcast %cst_150 : f32 to vector<8x128xf32>
    %362 = arith.subf %361, %350 : vector<8x128xf32>
    %363 = arith.mulf %362, %360 : vector<8x128xf32>
    %364 = arith.mulf %350, %324 : vector<8x128xf32>
    %365 = arith.addf %363, %364 : vector<8x128xf32>
    %366 = arith.index_cast %c7_i32 : i32 to index
    %c0_151 = arith.constant 0 : index
    %c0_152 = arith.constant 0 : index
    %367 = vector.load %arg3[%366, %c0_151, %c0_152] : memref<8x8x128xf32, #tpu.memory_space<vmem>>, vector<1x8x128xf32>
    %368 = vector.shape_cast %367 : vector<1x8x128xf32> to vector<8x128xf32>
    %369 = arith.addf %365, %368 : vector<8x128xf32>
    %370 = arith.index_cast %c7_i32 : i32 to index
    %c0_153 = arith.constant 0 : index
    %c0_154 = arith.constant 0 : index
    %371 = vector.load %arg9[%370, %c0_153, %c0_154] : memref<8x8x128xf32, #tpu.memory_space<vmem>>, vector<1x8x128xf32>
    %372 = vector.shape_cast %371 : vector<1x8x128xf32> to vector<8x128xf32>
    %373 = vector.shape_cast %369 : vector<8x128xf32> to vector<1x8x128xf32>
    tpu.vector_store %arg9[%370, %c0_153, %c0_154], %373 {strides = array<i32>} : memref<8x8x128xf32, #tpu.memory_space<vmem>>, vector<1x8x128xf32>,
    %c8_i32 = arith.constant 8 : i32
    %c0_155 = arith.constant 0 : index
    %c0_156 = arith.constant 0 : index
    %374 = vector.load %arg11[%c0_155, %c0_156] : memref<8x128xf32, #tpu.memory_space<vmem>>, vector<8x128xf32>
    tpu.vector_store %arg11[%c0_155, %c0_156], %369 {strides = array<i32>} : memref<8x128xf32, #tpu.memory_space<vmem>>, vector<8x128xf32>,
    return
  }
  func.func @transform_0(%arg0: i32, %arg1: i32) -> (i32, i32, i32) {
    %c0_i32 = arith.constant 0 : i32
    %c0_i32_0 = arith.constant 0 : i32
    return %arg1, %arg0, %c0_i32 : i32, i32, i32
  }
  func.func @transform_1(%arg0: i32, %arg1: i32) -> (i32, i32, i32) {
    %c0_i32 = arith.constant 0 : i32
    %c0_i32_0 = arith.constant 0 : i32
    return %arg1, %arg0, %c0_i32 : i32, i32, i32
  }
  func.func @transform_2(%arg0: i32, %arg1: i32) -> (i32, i32) {
    %c0_i32 = arith.constant 0 : i32
    %c0_i32_0 = arith.constant 0 : i32
    %c0_i32_1 = arith.constant 0 : i32
    return %c0_i32, %c0_i32_0 : i32, i32
  }
  func.func @transform_3(%arg0: i32, %arg1: i32) -> (i32, i32) {
    %c0_i32 = arith.constant 0 : i32
    %c0_i32_0 = arith.constant 0 : i32
    %c0_i32_1 = arith.constant 0 : i32
    return %c0_i32, %c0_i32_0 : i32, i32
  }
  func.func @transform_4(%arg0: i32, %arg1: i32) -> (i32, i32) {
    %c0_i32 = arith.constant 0 : i32
    %c0_i32_0 = arith.constant 0 : i32
    %c0_i32_1 = arith.constant 0 : i32
    return %c0_i32, %c0_i32_0 : i32, i32
  }
  func.func @transform_5(%arg0: i32, %arg1: i32) -> (i32, i32) {
    %c0_i32 = arith.constant 0 : i32
    %c0_i32_0 = arith.constant 0 : i32
    %c0_i32_1 = arith.constant 0 : i32
    return %c0_i32, %c0_i32_0 : i32, i32
  }
  func.func @transform_6(%arg0: i32, %arg1: i32) -> (i32, i32) {
    %c0_i32 = arith.constant 0 : i32
    %c0_i32_0 = arith.constant 0 : i32
    %c0_i32_1 = arith.constant 0 : i32
    return %c0_i32, %c0_i32_0 : i32, i32
  }
  func.func @transform_7(%arg0: i32, %arg1: i32) -> (i32, i32, i32) {
    %c0_i32 = arith.constant 0 : i32
    %c0_i32_0 = arith.constant 0 : i32
    return %arg1, %arg0, %c0_i32 : i32, i32, i32
  }
}

</mosaic_0001>

<bundles_post_ra>
// kernel: tpu_custom_call.1
= control target key start
LH: loop header
LB: loop body
LE: loop exit
PB: predicated region body
PF: predicated region fallthrough
CT: control target
= control target key end

     0   :  { %12 = vsyncpa [#allocation5], 0  ;;  %s3814_s0 = inlined_call_operand.vmem [shape: f32[8,8,4], index: 0, kind: input, shape index: {}]   ;;  %s3815_s1 = inlined_call_operand.vmem [shape: f32[8,8,128], index: 1, kind: input, shape index: {}]   ;;  %s3816_s2 = inlined_call_operand.vmem [shape: f32[1,128], index: 2, kind: input, shape index: {}]   ;;  %s3817_s3 = inlined_call_operand.vmem [shape: f32[4,384], index: 3, kind: input, shape index: {}]   ;;  %s3818_s4 = inlined_call_operand.vmem [shape: f32[1,384], index: 4, kind: input, shape index: {}]   ;;  %s3819_s5 = inlined_call_operand.hbm [shape: f32[128,384], index: 5, kind: input, shape index: {}]   ;;  %s3820_s6 = inlined_call_operand.vmem [shape: f32[1,128], index: 6, kind: input, shape index: {}]   ;;  %s3821_s7 = inlined_call_operand.hbm [shape: f32[8,8,128], index: 7, kind: output, shape index: {}]  }
   0x1   :  { %13 = vsyncpa [#allocation6], 0  ;;  %s2836_s24 = smov [#allocation4]  }
   0x2   :  { %s29_s25 = sshll.u32 %s2836_s24, 4  ;;  %s30_s25 = int_to_ptr.vmem [resolvable:$true] %s29_s25 }
   0x3   :  { %s2800_s26 = scalar_lea.vmem %s30_s25, 6144  ;;  %p2805_p1 = scmp.lt.s32.totalorder %s30_s25, %s30_s25 }
   0x4   :  { %p2801_p0 = scmp.ne.s32.totalorder %s30_s25, %s2800_s26  ;;  %p2806_p2 = scmp.lt.s32.totalorder %s2800_s26, %s2800_s26 }
   0x6   :  { %p2807_p3 = por %p2806_p2, %p2805_p1 }
   0x8   :  { %p2808_p4 = pnand %p2807_p3, %p2801_p0 }
   0xa   :  { %2811 = shalt.err (!%p2808_p4)
}
   0xb   :  { %s2837_s27 = smov 384   ;;  %s2838_s28 = smov 24  }
   0xc   :  { %35 = dma.hbm_to_vmem [thread:$0]  %s3819_s5, 6144, %s30_s25, [#allocation5], %s2837_s27, %s2837_s27, %s2838_s28  }
   0xd   :  { %2832 = dma.done.wait [#allocation5], 6144  }
   0xe   :  { %2833 = vsyncadd [#allocation5], 4294961152  ;;  %v3822_v0 = vmov 0.0   ;;  %v61_v1 = vld [vmem:[%s3817_s3] sm:$0xff]  ;;  %vm91_vm0 = vcmask 1043456   ;;  %vm66_vm1 = vcmask 31744   ;;  %v318_v61 = vlaneseq }
   0xf   :  { %162 = vmatprep.mubr.f32.mxu0 %v3822_v0  ;;  %v53_v2 = vld [vmem:[%s3814_s0] sm:$0xff]  ;;  %v65_v3 = vcombine.high %v61_v1, %v61_v1  ;;  %v2895_v4 = vld [vmem:[#allocation4 + $0x170] sm:$0xff]  ;;  %v2898_v5 = vld [vmem:[#allocation4 + $0x168] sm:$0xff]  ;;  %vm2840_vm2 = vmmov 0   ;;  %s2841_s19 = smov [#allocation7]  }
  0x10   :  { %2411 = vmatprep.mubr.msk.f32.mxu1 %vm66_vm1, %v53_v2  ;;  %3842 = vst [vmem:[#allocation10_spill] sm:$0xff] %v2895_v4  ;;  %v2901_v6 = vld [vmem:[#allocation4 + $0x158] sm:$0xff]  ;;  %v2905_v7 = vld [vmem:[#allocation4 + $0x150] sm:$0xff]  ;;  %v54_v8 = vld [vmem:[%s3814_s0 + $0x8] sm:$0xff]  ;;  %v319_v62 = vshrl.u32 %v318_v61, 7  ;;  %s2201_s20 = sshll.u32 %s2841_s19, 4  ;;  %s2202_s20 = int_to_ptr.vmem [resolvable:$true] %s2201_s20 }
  0x11   :  { %2214 = vmatprep.subr.msk.mxu0 %vm91_vm0, %v65_v3  ;;  %v2912_v9 = vld [vmem:[#allocation4 + $0x140] sm:$0xff]  ;;  %v2915_v10 = vld [vmem:[#allocation4 + $0x138] sm:$0xff]  ;;  %v2918_v11 = vld [vmem:[#allocation4 + $0x128] sm:$0xff]  ;;  %s2812_s23 = scalar_lea.vmem %s2202_s20, 1024  ;;  %p2817_p6 = scmp.lt.s32.totalorder %s2202_s20, %s2202_s20 }
  0x12   :  { %2215 = vmatpush1.msk.msra.mxu0 %vm91_vm0, %v61_v1  ;;  %v2922_v12 = vld [vmem:[#allocation4 + $0x120] sm:$0xff]  ;;  %v2929_v13 = vld [vmem:[%s3814_s0 + $0x10] sm:$0xff]  ;;  %v2934_v15 = vld [vmem:[#allocation4 + $0x108] sm:$0xff]  ;;  %v320_v63 = vsub.s32 0, %v319_v62  ;;  %v324_v3 = vsub.s32 1, %v319_v62  ;;  %p2813_p5 = scmp.ne.s32.totalorder %s2202_s20, %s2812_s23  ;;  %p2818_p7 = scmp.lt.s32.totalorder %s2812_s23, %s2812_s23 }
  0x13   :  { %2216 = vmatmul.mubr.msk.f32.vlgmr.msra.gmra.mxu0 %vm66_vm1, %v53_v2  ;;  %430 = vmatprep.subr.mxu0 %v2895_v4  ;;  %v2931_v14 = vld [vmem:[#allocation4 + $0x110] sm:$0xff]  ;;  %v2937_v16 = vld [vmem:[#allocation4 + $0xf8] sm:$0xff]  ;;  %v62_v17 = vld [vmem:[%s3817_s3 + $0x8] sm:$0xf] }
  0x14   :  { %431 = vmatpush1.msra.mxu0 %v2898_v5  ;;  %168 = vmatprep.mubr.f32.mxu0 %v3822_v0  ;;  %v2945_v18 = vld [vmem:[#allocation4 + $0xf0] sm:$0xff]  ;;  %v2952_v19 = vld [vmem:[%s3814_s0 + $0x18] sm:$0xff]  ;;  %v2954_v20 = vld [vmem:[#allocation4 + $0xe0] sm:$0xff]  ;;  %p2819_p8 = por %p2818_p7, %p2817_p6 }
  0x15   :  { %432 = vmatprep.subr.mxu0 %v2901_v6  ;;  %v2957_v21 = vld [vmem:[#allocation4 + $0xd8] sm:$0xff]  ;;  %2409 = vmatprep.subr.msk.mxu1 %vm91_vm0, %v62_v17  ;;  %v2961_v22 = vld [vmem:[#allocation4 + $0xc8] sm:$0xff]  ;;  %v2967_v23 = vld [vmem:[#allocation4 + $0xc0] sm:$0xff] }
  0x16   :  { %433 = vmatpush1.msra.mxu0 %v2905_v7  ;;  %2410 = vmatpush3.msk.msra.mxu1 %vm91_vm0, %v62_v17  ;;  %v2974_v24 = vld [vmem:[%s3814_s0 + $0x20] sm:$0xff]  ;;  %v2976_v25 = vld [vmem:[#allocation4 + $0xb0] sm:$0xff]  ;;  %v2979_v26 = vld [vmem:[#allocation4 + $0xa8] sm:$0xff]  ;;  %p2820_p9 = pnand %p2819_p8, %p2813_p5 }
  0x17   :  { %2217 = vmatmul.mubr.msk.f32.gmra.mxu0 %vm66_vm1, %v54_v8  ;;  %434 = vmatprep.subr.mxu0 %v2912_v9  ;;  %v2983_v27 = vld [vmem:[#allocation4 + $0x98] sm:$0xff]  ;;  %v2991_v29 = vld [vmem:[#allocation4 + $0x90] sm:$0xff]  ;;  %v2998_v30 = vld [vmem:[%s3814_s0 + $0x28] sm:$0xff] }
  0x18   :  { %435 = vmatpush1.msra.mxu0 %v2915_v10  ;;  %174 = vmatprep.mubr.f32.mxu0 %v3822_v0  ;;  %v2986_v28 = vld [vmem:[#allocation4 + $0x178] sm:$0xff]  ;;  %v3000_v31 = vld [vmem:[#allocation4 + $0x80] sm:$0xff]  ;;  %v3007_v33 = vld [vmem:[#allocation4 + $0x68] sm:$0xff] }
  0x19   :  { %436 = vmatprep.subr.mxu0 %v2918_v11  ;;  %2423 = vmatprep.subr.mxu1 %v3822_v0  ;;  %v3003_v32 = vld [vmem:[#allocation4 + $0x78] sm:$0xff]  ;;  %v3010_v34 = vld [vmem:[#allocation4 + $0x160] sm:$0xff]  ;;  %v59_v36 = vld [vmem:[%s3814_s0 + $0x30] sm:$0xff] }
  0x1a   :  { %437 = vmatpush1.msra.mxu0 %v2922_v12  ;;  %2412 = vmatmul.mubr.msk.f32.vlgmr.msra.gmra.mxu1 %vm66_vm1, %v54_v8  ;;  %v3015_v35 = vld [vmem:[#allocation4 + $0x60] sm:$0xff]  ;;  %v3022_v37 = vld [vmem:[#allocation4 + $0x50] sm:$0xff]  ;;  %v3025_v38 = vld [vmem:[#allocation4 + $0x48] sm:$0xff] }
  0x1b   :  { %2218 = vmatmul.mubr.msk.f32.gmra.mxu0 %vm66_vm1, %v2929_v13  ;;  %438 = vmatprep.subr.mxu0 %v2931_v14  ;;  %v3029_v39 = vld [vmem:[#allocation4 + $0x38] sm:$0xff]  ;;  %v3032_v40 = vld [vmem:[#allocation4 + $0x148] sm:$0xff]  ;;  %v3036_v41 = vld [vmem:[#allocation4 + $0x30] sm:$0xff] }
  0x1c   :  { %439 = vmatpush1.msra.mxu0 %v2934_v15  ;;  %180 = vmatprep.mubr.f32.mxu0 %v3822_v0  ;;  %v60_v42 = vld [vmem:[%s3814_s0 + $0x38] sm:$0xff]  ;;  %v3043_v43 = vld [vmem:[#allocation4 + $0x20] sm:$0xff]  ;;  %v3050_v45 = vld [vmem:[#allocation4 + $0x8] sm:$0xff] }
  0x1d   :  { %440 = vmatprep.subr.mxu0 %v2937_v16  ;;  %2424 = vmatpush3.msra.mxu1 %v2986_v28  ;;  %v3046_v44 = vld [vmem:[#allocation4 + $0x18] sm:$0xff]  ;;  %3844 = vst [vmem:[#allocation12_spill] sm:$0xff] %v3050_v45  ;;  %v3053_v46 = vld [vmem:[#allocation4 + $0x130] sm:$0xff]  ;;  %v3057_v47 = vld [vmem:[#allocation4] sm:$0xff] }
  0x1e   :  { %441 = vmatpush1.msra.mxu0 %v2945_v18  ;;  %2425 = vmatprep.subr.mxu1 %v3822_v0  ;;  %3843 = vst [vmem:[#allocation11_spill] sm:$0xff] %v3046_v44  ;;  %3845 = vst [vmem:[#allocation13_spill] sm:$0xff] %v3057_v47  ;;  %v3064_v48 = vld [vmem:[%s3816_s2] ss:$0 sm:$0xff]  ;;  %v3066_v49 = vld [vmem:[#allocation4 + $0x118] sm:$0xff] }
  0x1f   :  { %2219 = vmatmul.mubr.msk.f32.gmra.mxu0 %vm66_vm1, %v2952_v19  ;;  %442 = vmatprep.subr.mxu0 %v2954_v20  ;;  %v3072_v50 = vld [vmem:[#allocation4 + $0x100] sm:$0xff]  ;;  %v3077_v51 = vld [vmem:[#allocation4 + $0xe8] sm:$0xff]  ;;  %v3084_v52 = vld [vmem:[#allocation4 + $0xd0] sm:$0xff] }
  0x20   :  { %443 = vmatpush1.msra.mxu0 %v2957_v21  ;;  %186 = vmatprep.mubr.f32.mxu0 %v3822_v0  ;;  %v3092_v53 = vld [vmem:[#allocation4 + $0xb8] sm:$0xff]  ;;  %v3098_v54 = vld [vmem:[#allocation4 + $0xa0] sm:$0xff]  ;;  %v3105_v55 = vld [vmem:[#allocation4 + $0x88] sm:$0xff] }
  0x21   :  { %444 = vmatprep.subr.mxu0 %v2961_v22  ;;  %2426 = vmatpush3.msra.mxu1 %v3010_v34  ;;  %v3111_v56 = vld [vmem:[#allocation4 + $0x70] sm:$0xff]  ;;  %v3118_v57 = vld [vmem:[#allocation4 + $0x58] sm:$0xff]  ;;  %v3124_v58 = vld [vmem:[#allocation4 + $0x40] sm:$0xff] }
  0x22   :  { %445 = vmatpush1.msra.mxu0 %v2967_v23  ;;  %2427 = vmatprep.subr.mxu1 %v3822_v0  ;;  %v3130_v59 = vld [vmem:[#allocation4 + $0x28] sm:$0xff]  ;;  %v3136_v60 = vld [vmem:[#allocation4 + $0x10] sm:$0xff]  ;;  %v316_v2 = vld [vmem:[%s3818_s4] sm:$0x7] }
  0x23   :  { %2220 = vmatmul.mubr.msk.f32.gmra.mxu0 %vm66_vm1, %v2974_v24  ;;  %446 = vmatprep.subr.mxu0 %v2976_v25  ;;  %3846 = vst [vmem:[#allocation14_spill] sm:$0xff] %v3130_v59  ;;  %3847 = vst [vmem:[#allocation15_spill] sm:$0xff] %v3136_v60 }
  0x24   :  { %447 = vmatpush1.msra.mxu0 %v2979_v26  ;;  %192 = vmatprep.mubr.f32.mxu0 %v3822_v0 }
  0x25   :  { %448 = vmatprep.subr.mxu0 %v2983_v27  ;;  %2428 = vmatpush3.msra.mxu1 %v3032_v40 }
  0x26   :  { %449 = vmatpush1.msra.mxu0 %v2991_v29  ;;  %2429 = vmatprep.subr.mxu1 %v3822_v0 }
  0x27   :  { %2221 = vmatmul.mubr.msk.f32.gmra.mxu0 %vm66_vm1, %v2998_v30  ;;  %450 = vmatprep.subr.mxu0 %v3000_v31 }
  0x28   :  { %451 = vmatpush1.msra.mxu0 %v3003_v32  ;;  %198 = vmatprep.mubr.f32.mxu0 %v3822_v0 }
  0x29   :  { %452 = vmatprep.subr.mxu0 %v3007_v33  ;;  %2430 = vmatpush3.msra.mxu1 %v3053_v46 }
  0x2a   :  { %453 = vmatpush1.msra.mxu0 %v3015_v35  ;;  %2431 = vmatprep.subr.mxu1 %v3822_v0 }
  0x2b   :  { %2222 = vmatmul.mubr.msk.f32.gmra.mxu0 %vm66_vm1, %v59_v36  ;;  %454 = vmatprep.subr.mxu0 %v3022_v37 }
  0x2c   :  { %455 = vmatpush1.msra.mxu0 %v3025_v38  ;;  %204 = vmatprep.mubr.f32.mxu0 %v3822_v0 }
  0x2d   :  { %456 = vmatprep.subr.mxu0 %v3029_v39  ;;  %2432 = vmatpush3.msra.mxu1 %v3066_v49 }
  0x2e   :  { %457 = vmatpush1.msra.mxu0 %v3036_v41  ;;  %2433 = vmatprep.subr.mxu1 %v3822_v0 }
  0x2f   :  { %2223 = vmatmul.mubr.msk.f32.gmra.mxu0 %vm66_vm1, %v60_v42  ;;  %458 = vmatprep.subr.mxu0 %v3043_v43 }
  0x30   :  { %459 = vmatpush1.msra.mxu0 %v3046_v44  ;;  %494 = vmatprep.mubr.f32.mxu0 %v3822_v0 }
  0x31   :  { %460 = vmatprep.subr.mxu0 %v3050_v45  ;;  %2414 = vmatprep.mubr.msk.f32.mxu1 %vm66_vm1, %v2929_v13  ;;  %v321_v13 = vrot.slane %v316_v2, %v320_v63 }
  0x32   :  { %461 = vmatpush1.msra.mxu0 %v3057_v47  ;;  %2434 = vmatpush3.msra.mxu1 %v3072_v50 }
  0x33   :  { %495 = vmatmul.mubr.f32.vlgmr.msra.gmra.mxu0 %v3064_v48  ;;  %654 = vmatprep.subr.mxu0 %v2895_v4 }
  0x34   :  { %2435 = vmatprep.subr.mxu1 %v3822_v0  ;;  %2415 = vmatmul.mubr.msk.f32.gmra.mxu1 %vm66_vm1, %v2952_v19  ;;  %v325_v19 = vrot.slane %v316_v2, %v324_v3 }
  0x35   :  { %2436 = vmatpush3.msra.mxu1 %v3077_v51  ;;  %2417 = vmatprep.mubr.msk.f32.mxu1 %vm66_vm1, %v2974_v24 }
  0x36   :  { %2437 = vmatprep.subr.mxu1 %v3822_v0  ;;  %655 = vmatpush1.msra.mxu0 %v2898_v5 }
  0x37   :  { %2438 = vmatpush3.msra.mxu1 %v3084_v52  ;;  %656 = vmatprep.subr.mxu0 %v2901_v6 }
  0x38   :  { %2439 = vmatprep.subr.mxu1 %v3822_v0  ;;  %2418 = vmatmul.mubr.msk.f32.gmra.mxu1 %vm66_vm1, %v2998_v30 }
  0x39   :  { %2440 = vmatpush3.msra.mxu1 %v3092_v53  ;;  %2420 = vmatprep.mubr.msk.f32.mxu1 %vm66_vm1, %v59_v36 }
  0x3a   :  { %2441 = vmatprep.subr.mxu1 %v3822_v0  ;;  %657 = vmatpush1.msra.mxu0 %v2905_v7 }
  0x3b   :  { %2442 = vmatpush3.msra.mxu1 %v3098_v54  ;;  %658 = vmatprep.subr.mxu0 %v2912_v9 }
  0x3c   :  { %2443 = vmatprep.subr.mxu1 %v3822_v0  ;;  %2421 = vmatmul.mubr.msk.f32.gmra.mxu1 %vm66_vm1, %v60_v42 }
  0x3d   :  { %2444 = vmatpush3.msra.mxu1 %v3105_v55  ;;  %2455 = vmatprep.mubr.msk.f32.mxu1 %vm2840_vm2, %v3822_v0 }
  0x3e   :  { %2445 = vmatprep.subr.mxu1 %v3822_v0  ;;  %659 = vmatpush1.msra.mxu0 %v2915_v10 }
  0x3f   :  { %2446 = vmatpush3.msra.mxu1 %v3111_v56  ;;  %660 = vmatprep.subr.mxu0 %v2918_v11 }
  0x40   :  { %2447 = vmatprep.subr.mxu1 %v3822_v0  ;;  %661 = vmatpush1.msra.mxu0 %v2922_v12 }
  0x41   :  { %2448 = vmatpush3.msra.mxu1 %v3118_v57  ;;  %662 = vmatprep.subr.mxu0 %v2931_v14 }
  0x42   :  { %2449 = vmatprep.subr.mxu1 %v3822_v0  ;;  %663 = vmatpush1.msra.mxu0 %v2934_v15 }
  0x43   :  { %2450 = vmatpush3.msra.mxu1 %v3124_v58  ;;  %664 = vmatprep.subr.mxu0 %v2937_v16 }
  0x44   :  { %2451 = vmatprep.subr.mxu1 %v3822_v0  ;;  %665 = vmatpush1.msra.mxu0 %v2945_v18 }
  0x45   :  { %2452 = vmatpush3.msra.mxu1 %v3130_v59  ;;  %666 = vmatprep.subr.mxu0 %v2954_v20 }
  0x46   :  { %2453 = vmatprep.subr.mxu1 %v3822_v0  ;;  %667 = vmatpush1.msra.mxu0 %v2957_v21 }
  0x47   :  { %2454 = vmatpush3.msra.mxu1 %v3136_v60  ;;  %668 = vmatprep.subr.mxu0 %v2961_v22 }
  0x48   :  { %2456 = vmatmul.mubr.f32.vlgmr.msra.gmra.mxu1 %v3064_v48  ;;  %2458 = vmatprep.subr.mxu1 %v3822_v0 }
  0x49   :  { %2459 = vmatpush3.msra.mxu1 %v2986_v28  ;;  %669 = vmatpush1.msra.mxu0 %v2967_v23 }
  0x4a   :  { %2460 = vmatprep.subr.mxu1 %v3822_v0  ;;  %670 = vmatprep.subr.mxu0 %v2976_v25 }
  0x4b   :  { %2461 = vmatpush3.msra.mxu1 %v3010_v34  ;;  %671 = vmatpush1.msra.mxu0 %v2979_v26 }
  0x4c   :  { %2462 = vmatprep.subr.mxu1 %v3822_v0  ;;  %672 = vmatprep.subr.mxu0 %v2983_v27 }
  0x4d   :  { %2463 = vmatpush3.msra.mxu1 %v3032_v40  ;;  %673 = vmatpush1.msra.mxu0 %v2991_v29 }
  0x4e   :  { %2464 = vmatprep.subr.mxu1 %v3822_v0  ;;  %674 = vmatprep.subr.mxu0 %v3000_v31 }
  0x4f   :  { %2465 = vmatpush3.msra.mxu1 %v3053_v46  ;;  %675 = vmatpush1.msra.mxu0 %v3003_v32 }
  0x50   :  { %2466 = vmatprep.subr.mxu1 %v3822_v0  ;;  %676 = vmatprep.subr.mxu0 %v3007_v33 }
  0x51   :  { %2467 = vmatpush3.msra.mxu1 %v3066_v49  ;;  %677 = vmatpush1.msra.mxu0 %v3015_v35 }
  0x52   :  { %2468 = vmatprep.subr.mxu1 %v3822_v0  ;;  %678 = vmatprep.subr.mxu0 %v3022_v37 }
  0x53   :  { %2469 = vmatpush3.msra.mxu1 %v3072_v50  ;;  %679 = vmatpush1.msra.mxu0 %v3025_v38 }
  0x54   :  { %2470 = vmatprep.subr.mxu1 %v3822_v0  ;;  %680 = vmatprep.subr.mxu0 %v3029_v39 }
  0x55   :  { %2471 = vmatpush3.msra.mxu1 %v3077_v51  ;;  %681 = vmatpush1.msra.mxu0 %v3036_v41 }
  0x56   :  { %2472 = vmatprep.subr.mxu1 %v3822_v0  ;;  %682 = vmatprep.subr.mxu0 %v3043_v43 }
  0x57   :  { %2473 = vmatpush3.msra.mxu1 %v3084_v52  ;;  %683 = vmatpush1.msra.mxu0 %v3046_v44 }
  0x58   :  { %2474 = vmatprep.subr.mxu1 %v3822_v0  ;;  %684 = vmatprep.subr.mxu0 %v3050_v45 }
  0x59   :  { %2475 = vmatpush3.msra.mxu1 %v3092_v53  ;;  %685 = vmatpush1.msra.mxu0 %v3057_v47 }
  0x5a   :  { %2476 = vmatprep.subr.mxu1 %v3822_v0  ;;  %718 = vmatprep.mubr.f32.mxu0 %v3822_v0 }
  0x5b   :  { %2477 = vmatpush3.msra.mxu1 %v3098_v54  ;;  %2490 = vmatprep.mubr.msk.f32.mxu1 %vm2840_vm2, %v3822_v0 }
  0x5c   :  { %2478 = vmatprep.subr.mxu1 %v3822_v0  ;;  %881 = vmatprep.subr.mxu0 %v2895_v4 }
  0x5d   :  { %2479 = vmatpush3.msra.mxu1 %v3105_v55 }
  0x5e   :  { %2480 = vmatprep.subr.mxu1 %v3822_v0 }
  0x5f   :  { %2481 = vmatpush3.msra.mxu1 %v3111_v56 }
  0x60   :  { %2482 = vmatprep.subr.mxu1 %v3822_v0 }
  0x61   :  { %2483 = vmatpush3.msra.mxu1 %v3118_v57 }
  0x62   :  { %2484 = vmatprep.subr.mxu1 %v3822_v0 }
  0x63   :  { %2485 = vmatpush3.msra.mxu1 %v3124_v58 }
  0x64   :  { %2486 = vmatprep.subr.mxu1 %v3822_v0 }
  0x65   :  { %2487 = vmatpush3.msra.mxu1 %v3130_v59 }
  0x66   :  { %2488 = vmatprep.subr.mxu1 %v3822_v0 }
  0x67   :  { %2489 = vmatpush3.msra.mxu1 %v3136_v60 }
  0x68   :  { %2493 = vmatprep.subr.mxu1 %v3822_v0  ;;  %v328_v0 = vsub.s32 2, %v319_v62 }
  0x6a   :  { %v329_v45 = vrot.slane %v316_v2, %v328_v0 }
  0xd3   :  { %v164_v1 = vpop.f32.mrf.mxu0 }
  0xd5   :  { %v166_v8 = vpop.f32.mrf.mxu0 }
  0xd7   :  { %v170_v17 = vpop.f32.mrf.mxu0 }
  0xd8   :  { %v3203_v24 = vadd.f32 %v321_v13, %v170_v17 }
  0xd9   :  { %v172_v30 = vpop.f32.mrf.mxu0 }
  0xda   :  { %3848 = vst [vmem:[#allocation16_spill] sm:$0xff] %v3203_v24  ;;  %v3205_v36 = vadd.f32 %v325_v19, %v172_v30  ;;  %v2413_v3 = vpop.f32.mrf.mxu1 }
  0xdb   :  { %v176_v42 = vpop.f32.mrf.mxu0  ;;  %v3215_v24 = vadd.f32 %v2413_v3, %v329_v45 }
  0xdc   :  { %3849 = vst [vmem:[#allocation17_spill] sm:$0xff] %v3205_v36  ;;  %v3207_v4 = vadd.f32 %v321_v13, %v176_v42 }
  0xdd   :  { %v178_v61 = vpop.f32.mrf.mxu0  ;;  %3854 = vst [vmem:[#allocation22_spill] sm:$0xff] %v3215_v24 }
  0xde   :  { %3850 = vst [vmem:[#allocation18_spill] sm:$0xff] %v3207_v4  ;;  %v3209_v60 = vadd.f32 %v325_v19, %v178_v61 }
  0xdf   :  { %v182_v47 = vpop.f32.mrf.mxu0 }
  0xe0   :  { %3851 = vst [vmem:[#allocation19_spill] sm:$0xff] %v3209_v60  ;;  %v3211_v59 = vadd.f32 %v321_v13, %v182_v47 }
  0xe1   :  { %v184_v44 = vpop.f32.mrf.mxu0 }
  0xe2   :  { %3852 = vst [vmem:[#allocation20_spill] sm:$0xff] %v3211_v59  ;;  %v3213_v63 = vadd.f32 %v325_v19, %v184_v44 }
  0xe3   :  { %v188_v17 = vpop.f32.mrf.mxu0 }
  0xe4   :  { %3853 = vst [vmem:[#allocation21_spill] sm:$0xff] %v3213_v63  ;;  %v3217_v30 = vadd.f32 %v321_v13, %v188_v17 }
  0xe5   :  { %v190_v36 = vpop.f32.mrf.mxu0 }
  0xe6   :  { %3855 = vst [vmem:[#allocation23_spill] sm:$0xff] %v3217_v30  ;;  %v3219_v62 = vadd.f32 %v325_v19, %v190_v36  ;;  %v333_v30 = vadd.f32 %v321_v13, %v164_v1 }
  0xe7   :  { %v194_v42 = vpop.f32.mrf.mxu0 }
  0xe8   :  { %3856 = vst [vmem:[#allocation24_spill] sm:$0xff] %v3219_v62  ;;  %v3221_v4 = vadd.f32 %v321_v13, %v194_v42  ;;  %v277_v42 = vpop.f32.mrf.mxu1 }
  0xe9   :  { %v196_v61 = vpop.f32.mrf.mxu0 }
  0xea   :  { %3857 = vst [vmem:[#allocation25_spill] sm:$0xff] %v3221_v4  ;;  %v3223_v60 = vadd.f32 %v325_v19, %v196_v61 }
  0xeb   :  { %v200_v0 = vpop.f32.mrf.mxu0 }
  0xec   :  { %3858 = vst [vmem:[#allocation26_spill] sm:$0xff] %v3223_v60  ;;  %v3225_v47 = vadd.f32 %v321_v13, %v200_v0  ;;  %v334_v0 = vadd.f32 %v325_v19, %v166_v8 }
  0xed   :  { %v202_v44 = vpop.f32.mrf.mxu0 }
  0xee   :  { %3859 = vst [vmem:[#allocation27_spill] sm:$0xff] %v3225_v47  ;;  %v3227_v2 = vadd.f32 %v325_v19, %v202_v44 }
  0xef   :  { %v206_v63 = vpop.f32.mrf.mxu0 }
  0xf0   :  { %3860 = vst [vmem:[#allocation28_spill] sm:$0xff] %v3227_v2  ;;  %v3229_v3 = vadd.f32 %v321_v13, %v206_v63 }
  0xf1   :  { %v208_v17 = vpop.f32.mrf.mxu0 }
  0xf2   :  { %3861 = vst [vmem:[#allocation29_spill] sm:$0xff] %v3229_v3  ;;  %v3231_v59 = vadd.f32 %v325_v19, %v208_v17 }
  0xf3   :  { %v496_v36 = vpop.f32.mrf.mxu0 }
  0xf4   :  { %3862 = vst [vmem:[#allocation30_spill] sm:$0xff] %v3231_v59  ;;  %v572_v62 = vadd.f32 %v496_v36, %v333_v30  ;;  %v2416_v24 = vpop.f32.mrf.mxu1 }
  0xf5   :  { %v498_v61 = vpop.f32.mrf.mxu0  ;;  %v3233_v60 = vadd.f32 %v2416_v24, %v329_v45 }
  0xf6   :  { %v2233_v4 = vmul.f32 -1.442695, %v572_v62  ;;  %v287_v47 = vpop.f32.mrf.mxu1  ;;  %v580_v2 = vadd.f32 %v498_v61, %v334_v0  ;;  %v3248_v61 = vld [vmem:[%s3820_s6] ss:$0 sm:$0xff] }
  0xf7   :  { %v3235_v44 = vadd.f32 %v329_v45, %v287_v47 }
  0xf8   :  { %2712 = vpow2.f32 %v2233_v4  ;;  %v2419_v63 = vpop.f32.mrf.mxu1  ;;  %v2234_v17 = vmul.f32 -1.442695, %v580_v2 }
  0xf9   :  { %v3237_v3 = vadd.f32 %v2419_v63, %v329_v45 }
  0xfa   :  { %v297_v1 = vpop.f32.mrf.mxu1  ;;  %2714 = vpow2.f32 %v2234_v17 }
  0xfb   :  { %3863 = vst [vmem:[#allocation31_spill] sm:$0xff] %v3237_v3  ;;  %v3239_v13 = vadd.f32 %v329_v45, %v297_v1  ;;  %v335_v1 = vadd.f32 %v329_v45, %v277_v42  ;;  %v2239_v42 = vld [vmem:[%s3815_s1 + $0x8] sm:$0xff] }
  0xfc   :  { %v2422_v30 = vpop.f32.mrf.mxu1 }
  0xfd   :  { %3864 = vst [vmem:[#allocation32_spill] sm:$0xff] %v3239_v13  ;;  %v3241_v36 = vadd.f32 %v2422_v30, %v329_v45 }
  0xfe   :  { %v307_v62 = vpop.f32.mrf.mxu1 }
  0xff   :  { %3865 = vst [vmem:[#allocation33_spill] sm:$0xff] %v3241_v36  ;;  %v3243_v59 = vadd.f32 %v329_v45, %v307_v62  ;;  %v3867_v45 = vmov 0.0  }
 0x101   :  { %3866 = vst [vmem:[#allocation34_spill] sm:$0xff] %v3243_v59  ;;  %v603_v59 = vld [vmem:[%s3815_s1] sm:$0xff] }
 0x105   :  { %v2713_v8 = vpop.eup %2712 }
 0x106   :  { %v576_v4 = vadd.f32 1.0, %v2713_v8 }
 0x107   :  { %v2715_v47 = vpop.eup %2714 }
 0x108   :  { %2716 = vrcp.f32 %v576_v4  ;;  %v567_v19 = vpop.f32.mrf.mxu1  ;;  %v584_v0 = vadd.f32 1.0, %v2715_v47 }
 0x109   :  { %v595_v2 = vadd.f32 %v3248_v61, %v567_v19 }
 0x10a   :  { %v2457_v24 = vpop.f32.mrf.mxu1  ;;  %2718 = vrcp.f32 %v584_v0  ;;  %v3419_v0 = vld [vmem:[#allocation4 + $0xa8] sm:$0xff] }
 0x115   :  { %v2717_v63 = vpop.eup %2716 }
 0x116   :  { %v596_v30 = vmul.f32 %v2717_v63, %v595_v2  ;;  %v3422_v2 = vld [vmem:[#allocation4 + $0x98] sm:$0xff]  ;;  %v3425_v63 = vld [vmem:[#allocation4 + $0x90] sm:$0xff] }
 0x117   :  { %v2719_v17 = vpop.eup %2718 }
 0x118   :  { %v597_v62 = vadd.f32 %v596_v30, %v335_v1  ;;  %v599_v8 = vsub.f32 1.0, %v2719_v17  ;;  %v601_v24 = vmul.f32 %v2719_v17, %v3064_v48  ;;  %v3428_v1 = vld [vmem:[#allocation4 + $0x80] sm:$0xff]  ;;  %v3431_v30 = vld [vmem:[#allocation4 + $0x78] sm:$0xff] }
 0x119   :  { %v3437_v17 = vld [vmem:[#allocation4 + $0x60] sm:$0xff] }
 0x11a   :  { %2720 = vtanh.f32 %v597_v62  ;;  %v3434_v62 = vld [vmem:[#allocation4 + $0x68] sm:$0xff] }
 0x127   :  { %v2721_v4 = vpop.eup %2720 }
 0x128   :  { %v600_v36 = vmul.f32 %v2721_v4, %v599_v8  ;;  %v3440_v8 = vld [vmem:[#allocation4 + $0x50] sm:$0xff]  ;;  %v3443_v4 = vld [vmem:[#allocation4 + $0x48] sm:$0xff] }
 0x12a   :  { %v602_v3 = vadd.f32 %v601_v24, %v600_v36  ;;  %v3446_v24 = vld [vmem:[#allocation4 + $0x38] sm:$0xff] }
 0x12c   :  { %v3255_v47 = vadd.f32 %v603_v59, %v602_v3 }
 0x12e   :  { %605 = vst [vmem:[#allocation7] sm:$0xff] %v3255_v47  ;;  %719 = vmatmul.mubr.f32.vlgmr.msra.gmra.mxu0 %v3255_v47  ;;  %2491 = vmatmul.mubr.f32.vlgmr.msra.gmra.mxu1 %v3255_v47 }
 0x12f   :  { %882 = vmatpush1.msra.mxu0 %v2898_v5  ;;  %2494 = vmatpush3.msra.mxu1 %v2986_v28 }
 0x130   :  { %883 = vmatprep.subr.mxu0 %v2901_v6  ;;  %2495 = vmatprep.subr.mxu1 %v3867_v45  ;;  %v3868_v6 = vld [vmem:[#allocation11_spill] sm:$0xff] }
 0x131   :  { %884 = vmatpush1.msra.mxu0 %v2905_v7  ;;  %2496 = vmatpush3.msra.mxu1 %v3010_v34  ;;  %v3869_v7 = vld [vmem:[#allocation14_spill] sm:$0xff] }
 0x132   :  { %885 = vmatprep.subr.mxu0 %v2912_v9  ;;  %2497 = vmatprep.subr.mxu1 %v3867_v45  ;;  %v3870_v9 = vld [vmem:[#allocation12_spill] sm:$0xff] }
 0x133   :  { %886 = vmatpush1.msra.mxu0 %v2915_v10  ;;  %2498 = vmatpush3.msra.mxu1 %v3032_v40  ;;  %v3871_v10 = vld [vmem:[#allocation13_spill] sm:$0xff] }
 0x134   :  { %887 = vmatprep.subr.mxu0 %v2918_v11  ;;  %2499 = vmatprep.subr.mxu1 %v3867_v45  ;;  %v3872_v11 = vld [vmem:[#allocation15_spill] sm:$0xff] }
 0x135   :  { %888 = vmatpush1.msra.mxu0 %v2922_v12  ;;  %2500 = vmatpush3.msra.mxu1 %v3053_v46  ;;  %v3873_v12 = vld [vmem:[#allocation10_spill] sm:$0xff] }
 0x136   :  { %889 = vmatprep.subr.mxu0 %v2931_v14  ;;  %2501 = vmatprep.subr.mxu1 %v3867_v45 }
 0x137   :  { %890 = vmatpush1.msra.mxu0 %v2934_v15  ;;  %2502 = vmatpush3.msra.mxu1 %v3066_v49 }
 0x138   :  { %891 = vmatprep.subr.mxu0 %v2937_v16  ;;  %2503 = vmatprep.subr.mxu1 %v3867_v45  ;;  %v3874_v16 = vld [vmem:[#allocation16_spill] sm:$0xff] }
 0x139   :  { %892 = vmatpush1.msra.mxu0 %v2945_v18  ;;  %2504 = vmatpush3.msra.mxu1 %v3072_v50 }
 0x13a   :  { %893 = vmatprep.subr.mxu0 %v2954_v20  ;;  %2505 = vmatprep.subr.mxu1 %v3867_v45 }
 0x13b   :  { %894 = vmatpush1.msra.mxu0 %v2957_v21  ;;  %2506 = vmatpush3.msra.mxu1 %v3077_v51 }
 0x13c   :  { %895 = vmatprep.subr.mxu0 %v2961_v22  ;;  %2507 = vmatprep.subr.mxu1 %v3867_v45 }
 0x13d   :  { %896 = vmatpush1.msra.mxu0 %v2967_v23  ;;  %2508 = vmatpush3.msra.mxu1 %v3084_v52  ;;  %v3875_v23 = vld [vmem:[#allocation17_spill] sm:$0xff] }
 0x13e   :  { %897 = vmatprep.subr.mxu0 %v2976_v25  ;;  %2509 = vmatprep.subr.mxu1 %v3867_v45 }
 0x13f   :  { %898 = vmatpush1.msra.mxu0 %v2979_v26  ;;  %2510 = vmatpush3.msra.mxu1 %v3092_v53 }
 0x140   :  { %899 = vmatprep.subr.mxu0 %v2983_v27  ;;  %2511 = vmatprep.subr.mxu1 %v3867_v45 }
 0x141   :  { %900 = vmatpush1.msra.mxu0 %v2991_v29  ;;  %2512 = vmatpush3.msra.mxu1 %v3098_v54 }
 0x142   :  { %901 = vmatprep.subr.mxu0 %v3000_v31  ;;  %2513 = vmatprep.subr.mxu1 %v3867_v45 }
 0x143   :  { %902 = vmatpush1.msra.mxu0 %v3003_v32  ;;  %2514 = vmatpush3.msra.mxu1 %v3105_v55 }
 0x144   :  { %903 = vmatprep.subr.mxu0 %v3007_v33  ;;  %2515 = vmatprep.subr.mxu1 %v3867_v45 }
 0x145   :  { %904 = vmatpush1.msra.mxu0 %v3015_v35  ;;  %2516 = vmatpush3.msra.mxu1 %v3111_v56 }
 0x146   :  { %905 = vmatprep.subr.mxu0 %v3022_v37  ;;  %2517 = vmatprep.subr.mxu1 %v3867_v45 }
 0x147   :  { %906 = vmatpush1.msra.mxu0 %v3025_v38  ;;  %2518 = vmatpush3.msra.mxu1 %v3118_v57  ;;  %v3876_v38 = vld [vmem:[#allocation22_spill] sm:$0xff] }
 0x148   :  { %907 = vmatprep.subr.mxu0 %v3029_v39  ;;  %2519 = vmatprep.subr.mxu1 %v3867_v45 }
 0x149   :  { %908 = vmatpush1.msra.mxu0 %v3036_v41  ;;  %2520 = vmatpush3.msra.mxu1 %v3124_v58 }
 0x14a   :  { %909 = vmatprep.subr.mxu0 %v3043_v43  ;;  %2521 = vmatprep.subr.mxu1 %v3867_v45 }
 0x14b   :  { %910 = vmatpush1.msra.mxu0 %v3868_v6  ;;  %2522 = vmatpush3.msra.mxu1 %v3869_v7  ;;  %v3452_v6 = vld [vmem:[#allocation4 + $0x20] sm:$0xff] }
 0x14c   :  { %911 = vmatprep.subr.mxu0 %v3870_v9  ;;  %2523 = vmatprep.subr.mxu1 %v3867_v45  ;;  %v3458_v9 = vld [vmem:[#allocation4 + $0x8] sm:$0xff] }
 0x14d   :  { %912 = vmatpush1.msra.mxu0 %v3871_v10  ;;  %945 = vmatprep.mubr.f32.mxu0 %v3867_v45  ;;  %3877 = vst [vmem:[#allocation11_spill] sm:$0xff] %v3458_v9  ;;  %v3461_v10 = vld [vmem:[#allocation4] sm:$0xff] }
 0x14e   :  { %2524 = vmatpush3.msra.mxu1 %v3872_v11  ;;  %2525 = vmatprep.mubr.msk.f32.mxu1 %vm2840_vm2, %v3867_v45  ;;  %3878 = vst [vmem:[#allocation14_spill] sm:$0xff] %v3461_v10 }
 0x14f   :  { %1108 = vmatprep.subr.mxu0 %v3873_v12  ;;  %2528 = vmatprep.subr.mxu1 %v3867_v45 }
 0x1ee   :  { %v720_v14 = vpop.f32.mrf.mxu0  ;;  %v791_v15 = vpop.f32.mrf.mxu1 }
 0x1ef   :  { %v797_v18 = vadd.f32 %v720_v14, %v3874_v16  ;;  %v820_v33 = vadd.f32 %v3248_v61, %v791_v15  ;;  %v3879_v14 = vld [vmem:[#allocation18_spill] sm:$0xff] }
 0x1f0   :  { %v2492_v20 = vpop.f32.mrf.mxu1  ;;  %v722_v22 = vpop.f32.mrf.mxu0 }
 0x1f1   :  { %v2236_v21 = vmul.f32 -1.442695, %v797_v18  ;;  %v805_v25 = vadd.f32 %v722_v22, %v3875_v23 }
 0x1f3   :  { %2722 = vpow2.f32 %v2236_v21  ;;  %v2237_v26 = vmul.f32 -1.442695, %v805_v25  ;;  %v3880_v21 = vld [vmem:[#allocation19_spill] sm:$0xff] }
 0x1f5   :  { %2724 = vpow2.f32 %v2237_v26 }
 0x200   :  { %v2723_v27 = vpop.eup %2722 }
 0x201   :  { %v801_v29 = vadd.f32 1.0, %v2723_v27 }
 0x202   :  { %v2725_v31 = vpop.eup %2724 }
 0x203   :  { %2726 = vrcp.f32 %v801_v29  ;;  %v809_v32 = vadd.f32 1.0, %v2725_v31 }
 0x205   :  { %2728 = vrcp.f32 %v809_v32 }
 0x210   :  { %v2727_v35 = vpop.eup %2726 }
 0x211   :  { %v821_v37 = vmul.f32 %v2727_v35, %v820_v33 }
 0x212   :  { %v2729_v41 = vpop.eup %2728 }
 0x213   :  { %v822_v39 = vadd.f32 %v821_v37, %v3876_v38  ;;  %v824_v43 = vsub.f32 1.0, %v2729_v41  ;;  %v826_v3 = vmul.f32 %v2729_v41, %v3255_v47  ;;  %v3449_v47 = vld [vmem:[#allocation4 + $0x30] sm:$0xff] }
 0x215   :  { %2730 = vtanh.f32 %v822_v39 }
 0x222   :  { %v2731_v48 = vpop.eup %2730 }
 0x223   :  { %v825_v59 = vmul.f32 %v2731_v48, %v824_v43  ;;  %v2243_v48 = vld [vmem:[%s3815_s1 + $0x10] sm:$0xff] }
 0x225   :  { %v827_v36 = vadd.f32 %v826_v3, %v825_v59 }
 0x227   :  { %v3335_v19 = vadd.f32 %v2239_v42, %v827_v36  ;;  %v3485_v42 = vld [vmem:[#allocation4 + $0x168] sm:$0xff]  ;;  %v3487_v36 = vld [vmem:[#allocation4 + $0x178] sm:$0xff] }
 0x229   :  { %832 = vst [vmem:[#allocation7 + $0x8] sm:$0xff] %v3335_v19  ;;  %946 = vmatmul.mubr.f32.vlgmr.msra.gmra.mxu0 %v3335_v19  ;;  %2526 = vmatmul.mubr.f32.vlgmr.msra.gmra.mxu1 %v3335_v19 }
 0x22a   :  { %1109 = vmatpush1.msra.mxu0 %v2898_v5  ;;  %2529 = vmatpush3.msra.mxu1 %v2986_v28  ;;  %v3376_v5 = vld [vmem:[#allocation4 + $0x158] sm:$0xff]  ;;  %v3379_v28 = vld [vmem:[#allocation4 + $0x150] sm:$0xff] }
 0x22b   :  { %2530 = vmatprep.subr.mxu1 %v3867_v45  ;;  %1172 = vmatprep.mubr.f32.mxu0 %v3867_v45 }
 0x22c   :  { %2531 = vmatpush3.msra.mxu1 %v3010_v34  ;;  %2560 = vmatprep.mubr.msk.f32.mxu1 %vm2840_vm2, %v3867_v45  ;;  %v3382_v34 = vld [vmem:[#allocation4 + $0x140] sm:$0xff] }
 0x22d   :  { %2532 = vmatprep.subr.mxu1 %v3867_v45  ;;  %1110 = vmatprep.subr.mxu0 %v3376_v5 }
 0x22e   :  { %2533 = vmatpush3.msra.mxu1 %v3032_v40  ;;  %1111 = vmatpush1.msra.mxu0 %v3379_v28  ;;  %v3385_v40 = vld [vmem:[#allocation4 + $0x138] sm:$0xff] }
 0x22f   :  { %2534 = vmatprep.subr.mxu1 %v3867_v45  ;;  %1112 = vmatprep.subr.mxu0 %v3382_v34 }
 0x230   :  { %2535 = vmatpush3.msra.mxu1 %v3053_v46  ;;  %1113 = vmatpush1.msra.mxu0 %v3385_v40  ;;  %v3388_v46 = vld [vmem:[#allocation4 + $0x128] sm:$0xff] }
 0x231   :  { %2536 = vmatprep.subr.mxu1 %v3867_v45  ;;  %1114 = vmatprep.subr.mxu0 %v3388_v46 }
 0x232   :  { %2537 = vmatpush3.msra.mxu1 %v3066_v49  ;;  %v3391_v49 = vld [vmem:[#allocation4 + $0x120] sm:$0xff] }
 0x233   :  { %2538 = vmatprep.subr.mxu1 %v3867_v45  ;;  %1115 = vmatpush1.msra.mxu0 %v3391_v49 }
 0x234   :  { %2539 = vmatpush3.msra.mxu1 %v3072_v50  ;;  %v3394_v50 = vld [vmem:[#allocation4 + $0x110] sm:$0xff] }
 0x235   :  { %2540 = vmatprep.subr.mxu1 %v3867_v45  ;;  %1116 = vmatprep.subr.mxu0 %v3394_v50 }
 0x236   :  { %2541 = vmatpush3.msra.mxu1 %v3077_v51  ;;  %v3397_v51 = vld [vmem:[#allocation4 + $0x108] sm:$0xff] }
 0x237   :  { %2542 = vmatprep.subr.mxu1 %v3867_v45  ;;  %1117 = vmatpush1.msra.mxu0 %v3397_v51 }
 0x238   :  { %2543 = vmatpush3.msra.mxu1 %v3084_v52  ;;  %v3400_v52 = vld [vmem:[#allocation4 + $0xf8] sm:$0xff] }
 0x239   :  { %2544 = vmatprep.subr.mxu1 %v3867_v45  ;;  %1118 = vmatprep.subr.mxu0 %v3400_v52 }
 0x23a   :  { %2545 = vmatpush3.msra.mxu1 %v3092_v53  ;;  %v3403_v53 = vld [vmem:[#allocation4 + $0xf0] sm:$0xff] }
 0x23b   :  { %2546 = vmatprep.subr.mxu1 %v3867_v45  ;;  %1119 = vmatpush1.msra.mxu0 %v3403_v53 }
 0x23c   :  { %2547 = vmatpush3.msra.mxu1 %v3098_v54  ;;  %v3406_v54 = vld [vmem:[#allocation4 + $0xe0] sm:$0xff] }
 0x23d   :  { %2548 = vmatprep.subr.mxu1 %v3867_v45  ;;  %1120 = vmatprep.subr.mxu0 %v3406_v54 }
 0x23e   :  { %2549 = vmatpush3.msra.mxu1 %v3105_v55  ;;  %v3409_v55 = vld [vmem:[#allocation4 + $0xd8] sm:$0xff] }
 0x23f   :  { %2550 = vmatprep.subr.mxu1 %v3867_v45  ;;  %1121 = vmatpush1.msra.mxu0 %v3409_v55 }
 0x240   :  { %2551 = vmatpush3.msra.mxu1 %v3111_v56  ;;  %v3411_v56 = vld [vmem:[#allocation4 + $0xc8] sm:$0xff] }
 0x241   :  { %2552 = vmatprep.subr.mxu1 %v3867_v45  ;;  %1122 = vmatprep.subr.mxu0 %v3411_v56 }
 0x242   :  { %2553 = vmatpush3.msra.mxu1 %v3118_v57  ;;  %v3413_v57 = vld [vmem:[#allocation4 + $0xc0] sm:$0xff] }
 0x243   :  { %2554 = vmatprep.subr.mxu1 %v3867_v45  ;;  %1123 = vmatpush1.msra.mxu0 %v3413_v57 }
 0x244   :  { %2555 = vmatpush3.msra.mxu1 %v3124_v58  ;;  %v3416_v58 = vld [vmem:[#allocation4 + $0xb0] sm:$0xff] }
 0x245   :  { %2556 = vmatprep.subr.mxu1 %v3867_v45  ;;  %1124 = vmatprep.subr.mxu0 %v3416_v58 }
 0x246   :  { %2557 = vmatpush3.msra.mxu1 %v3869_v7  ;;  %1125 = vmatpush1.msra.mxu0 %v3419_v0  ;;  %v3455_v7 = vld [vmem:[#allocation4 + $0x18] sm:$0xff] }
 0x247   :  { %2558 = vmatprep.subr.mxu1 %v3867_v45  ;;  %1126 = vmatprep.subr.mxu0 %v3422_v2 }
 0x248   :  { %2559 = vmatpush3.msra.mxu1 %v3872_v11  ;;  %1127 = vmatpush1.msra.mxu0 %v3425_v63 }
 0x249   :  { %2563 = vmatprep.subr.mxu1 %v3867_v45  ;;  %1128 = vmatprep.subr.mxu0 %v3428_v1 }
 0x24a   :  { %1129 = vmatpush1.msra.mxu0 %v3431_v30 }
 0x24b   :  { %1130 = vmatprep.subr.mxu0 %v3434_v62 }
 0x24c   :  { %1131 = vmatpush1.msra.mxu0 %v3437_v17 }
 0x24d   :  { %1132 = vmatprep.subr.mxu0 %v3440_v8 }
 0x24e   :  { %1133 = vmatpush1.msra.mxu0 %v3443_v4 }
 0x24f   :  { %1134 = vmatprep.subr.mxu0 %v3446_v24 }
 0x250   :  { %1135 = vmatpush1.msra.mxu0 %v3449_v47 }
 0x251   :  { %1136 = vmatprep.subr.mxu0 %v3452_v6 }
 0x252   :  { %1137 = vmatpush1.msra.mxu0 %v3455_v7 }
 0x253   :  { %1138 = vmatprep.subr.mxu0 %v3458_v9 }
 0x254   :  { %1139 = vmatpush1.msra.mxu0 %v3461_v10 }
 0x2e9   :  { %v947_v11 = vpop.f32.mrf.mxu0  ;;  %v1018_v12 = vpop.f32.mrf.mxu1 }
 0x2ea   :  { %v1024_v15 = vadd.f32 %v947_v11, %v3879_v14  ;;  %v1047_v31 = vadd.f32 %v3248_v61, %v1018_v12  ;;  %v3499_v11 = vld [vmem:[#allocation4 + $0x148] sm:$0xff]  ;;  %v3505_v12 = vld [vmem:[#allocation4 + $0x130] sm:$0xff]  ;;  %v3511_v14 = vld [vmem:[#allocation4 + $0x118] sm:$0xff] }
 0x2eb   :  { %v2527_v16 = vpop.f32.mrf.mxu1  ;;  %v949_v20 = vpop.f32.mrf.mxu0 }
 0x2ec   :  { %v2240_v18 = vmul.f32 -1.442695, %v1024_v15  ;;  %v1032_v22 = vadd.f32 %v949_v20, %v3880_v21  ;;  %v3517_v15 = vld [vmem:[#allocation4 + $0x100] sm:$0xff]  ;;  %v3523_v16 = vld [vmem:[#allocation4 + $0xe8] sm:$0xff]  ;;  %v3531_v20 = vld [vmem:[#allocation4 + $0xb8] sm:$0xff] }
 0x2ed   :  { %v3537_v21 = vld [vmem:[#allocation4 + $0xa0] sm:$0xff] }
 0x2ee   :  { %2732 = vpow2.f32 %v2240_v18  ;;  %v2241_v23 = vmul.f32 -1.442695, %v1032_v22  ;;  %v3525_v18 = vld [vmem:[#allocation4 + $0xd0] sm:$0xff]  ;;  %v3543_v22 = vld [vmem:[#allocation4 + $0x88] sm:$0xff] }
 0x2f0   :  { %2734 = vpow2.f32 %v2241_v23  ;;  %v3549_v23 = vld [vmem:[#allocation4 + $0x70] sm:$0xff] }
 0x2fb   :  { %v2733_v25 = vpop.eup %2732 }
 0x2fc   :  { %v1028_v26 = vadd.f32 1.0, %v2733_v25  ;;  %v3555_v25 = vld [vmem:[#allocation4 + $0x58] sm:$0xff] }
 0x2fd   :  { %v2735_v27 = vpop.eup %2734 }
 0x2fe   :  { %2736 = vrcp.f32 %v1028_v26  ;;  %v1036_v29 = vadd.f32 1.0, %v2735_v27  ;;  %v3561_v26 = vld [vmem:[#allocation4 + $0x40] sm:$0xff]  ;;  %v3567_v27 = vld [vmem:[#allocation4 + $0x28] sm:$0xff] }
 0x2ff   :  { %3882 = vst [vmem:[#allocation13_spill] sm:$0xff] %v3567_v27 }
 0x300   :  { %2738 = vrcp.f32 %v1036_v29  ;;  %v3573_v29 = vld [vmem:[#allocation4 + $0x10] sm:$0xff] }
 0x301   :  { %3883 = vst [vmem:[#allocation15_spill] sm:$0xff] %v3573_v29 }
 0x30b   :  { %v2737_v32 = vpop.eup %2736 }
 0x30c   :  { %v1048_v33 = vmul.f32 %v2737_v32, %v1047_v31 }
 0x30d   :  { %v2739_v37 = vpop.eup %2738 }
 0x30e   :  { %v1049_v35 = vadd.f32 %v1048_v33, %v3235_v44  ;;  %v1051_v38 = vsub.f32 1.0, %v2739_v37  ;;  %v1053_v43 = vmul.f32 %v2739_v37, %v3335_v19  ;;  %v3482_v44 = vld [vmem:[#allocation4 + $0x170] sm:$0xff]  ;;  %v3493_v19 = vld [vmem:[#allocation4 + $0x160] sm:$0xff] }
 0x30f   :  { %3881 = vst [vmem:[#allocation12_spill] sm:$0xff] %v3482_v44  ;;  %1335 = vmatprep.subr.mxu0 %v3482_v44  ;;  %v3884_v33 = vld [vmem:[#allocation20_spill] sm:$0xff] }
 0x310   :  { %2740 = vtanh.f32 %v1049_v35 }
 0x31d   :  { %v2741_v39 = vpop.eup %2740 }
 0x31e   :  { %v1052_v41 = vmul.f32 %v2741_v39, %v1051_v38 }
 0x320   :  { %v1054_v59 = vadd.f32 %v1053_v43, %v1052_v41  ;;  %v3885_v41 = vld [vmem:[#allocation21_spill] sm:$0xff] }
 0x322   :  { %v3474_v3 = vadd.f32 %v2243_v48, %v1054_v59 }
 0x324   :  { %1059 = vst [vmem:[#allocation7 + $0x10] sm:$0xff] %v3474_v3  ;;  %1173 = vmatmul.mubr.f32.vlgmr.msra.gmra.mxu0 %v3474_v3  ;;  %2561 = vmatmul.mubr.f32.vlgmr.msra.gmra.mxu1 %v3474_v3 }
 0x325   :  { %1399 = vmatprep.mubr.f32.mxu0 %v3867_v45  ;;  %2595 = vmatprep.mubr.msk.f32.mxu1 %vm2840_vm2, %v3867_v45 }
 0x326   :  { %1336 = vmatpush1.msra.mxu0 %v3485_v42  ;;  %2564 = vmatpush3.msra.mxu1 %v3487_v36 }
 0x327   :  { %1337 = vmatprep.subr.mxu0 %v3376_v5  ;;  %2565 = vmatprep.subr.mxu1 %v3867_v45 }
 0x328   :  { %1338 = vmatpush1.msra.mxu0 %v3379_v28  ;;  %2566 = vmatpush3.msra.mxu1 %v3493_v19 }
 0x329   :  { %1339 = vmatprep.subr.mxu0 %v3382_v34  ;;  %2567 = vmatprep.subr.mxu1 %v3867_v45 }
 0x32a   :  { %1340 = vmatpush1.msra.mxu0 %v3385_v40  ;;  %2568 = vmatpush3.msra.mxu1 %v3499_v11 }
 0x32b   :  { %1341 = vmatprep.subr.mxu0 %v3388_v46  ;;  %2569 = vmatprep.subr.mxu1 %v3867_v45 }
 0x32c   :  { %1342 = vmatpush1.msra.mxu0 %v3391_v49  ;;  %2570 = vmatpush3.msra.mxu1 %v3505_v12 }
 0x32d   :  { %1343 = vmatprep.subr.mxu0 %v3394_v50  ;;  %2571 = vmatprep.subr.mxu1 %v3867_v45 }
 0x32e   :  { %1344 = vmatpush1.msra.mxu0 %v3397_v51  ;;  %2572 = vmatpush3.msra.mxu1 %v3511_v14 }
 0x32f   :  { %1345 = vmatprep.subr.mxu0 %v3400_v52  ;;  %2573 = vmatprep.subr.mxu1 %v3867_v45 }
 0x330   :  { %1346 = vmatpush1.msra.mxu0 %v3403_v53  ;;  %2574 = vmatpush3.msra.mxu1 %v3517_v15 }
 0x331   :  { %1347 = vmatprep.subr.mxu0 %v3406_v54  ;;  %2575 = vmatprep.subr.mxu1 %v3867_v45 }
 0x332   :  { %1348 = vmatpush1.msra.mxu0 %v3409_v55  ;;  %2576 = vmatpush3.msra.mxu1 %v3523_v16 }
 0x333   :  { %1349 = vmatprep.subr.mxu0 %v3411_v56  ;;  %2577 = vmatprep.subr.mxu1 %v3867_v45 }
 0x334   :  { %1350 = vmatpush1.msra.mxu0 %v3413_v57  ;;  %2578 = vmatpush3.msra.mxu1 %v3525_v18 }
 0x335   :  { %1351 = vmatprep.subr.mxu0 %v3416_v58  ;;  %2579 = vmatprep.subr.mxu1 %v3867_v45 }
 0x336   :  { %1352 = vmatpush1.msra.mxu0 %v3419_v0  ;;  %2580 = vmatpush3.msra.mxu1 %v3531_v20 }
 0x337   :  { %1353 = vmatprep.subr.mxu0 %v3422_v2  ;;  %2581 = vmatprep.subr.mxu1 %v3867_v45 }
 0x338   :  { %1354 = vmatpush1.msra.mxu0 %v3425_v63  ;;  %2582 = vmatpush3.msra.mxu1 %v3537_v21 }
 0x339   :  { %1355 = vmatprep.subr.mxu0 %v3428_v1  ;;  %2583 = vmatprep.subr.mxu1 %v3867_v45 }
 0x33a   :  { %1356 = vmatpush1.msra.mxu0 %v3431_v30  ;;  %2584 = vmatpush3.msra.mxu1 %v3543_v22 }
 0x33b   :  { %1357 = vmatprep.subr.mxu0 %v3434_v62  ;;  %2585 = vmatprep.subr.mxu1 %v3867_v45 }
 0x33c   :  { %1358 = vmatpush1.msra.mxu0 %v3437_v17  ;;  %2586 = vmatpush3.msra.mxu1 %v3549_v23 }
 0x33d   :  { %1359 = vmatprep.subr.mxu0 %v3440_v8  ;;  %2587 = vmatprep.subr.mxu1 %v3867_v45 }
 0x33e   :  { %1360 = vmatpush1.msra.mxu0 %v3443_v4  ;;  %2588 = vmatpush3.msra.mxu1 %v3555_v25 }
 0x33f   :  { %1361 = vmatprep.subr.mxu0 %v3446_v24  ;;  %2589 = vmatprep.subr.mxu1 %v3867_v45 }
 0x340   :  { %1362 = vmatpush1.msra.mxu0 %v3449_v47  ;;  %2590 = vmatpush3.msra.mxu1 %v3561_v26 }
 0x341   :  { %1363 = vmatprep.subr.mxu0 %v3452_v6  ;;  %2591 = vmatprep.subr.mxu1 %v3867_v45 }
 0x342   :  { %1364 = vmatpush1.msra.mxu0 %v3455_v7  ;;  %2592 = vmatpush3.msra.mxu1 %v3567_v27 }
 0x343   :  { %1365 = vmatprep.subr.mxu0 %v3458_v9  ;;  %2593 = vmatprep.subr.mxu1 %v3867_v45 }
 0x344   :  { %1366 = vmatpush1.msra.mxu0 %v3461_v10  ;;  %2594 = vmatpush3.msra.mxu1 %v3573_v29 }
 0x345   :  { %1562 = vmatprep.subr.mxu0 %v3482_v44  ;;  %2598 = vmatprep.subr.mxu1 %v3867_v45 }
 0x3e4   :  { %v1174_v31 = vpop.f32.mrf.mxu0  ;;  %v1245_v32 = vpop.f32.mrf.mxu1 }
 0x3e5   :  { %v1251_v35 = vadd.f32 %v1174_v31, %v3884_v33  ;;  %v1274_v44 = vadd.f32 %v3248_v61, %v1245_v32  ;;  %v3887_v61 = vld [vmem:[#allocation11_spill] sm:$0xff] }
 0x3e6   :  { %v2562_v37 = vpop.f32.mrf.mxu1  ;;  %v1176_v39 = vpop.f32.mrf.mxu0  ;;  %v3891_v32 = vld [vmem:[#allocation23_spill] sm:$0xff] }
 0x3e7   :  { %v2244_v38 = vmul.f32 -1.442695, %v1251_v35  ;;  %v1259_v43 = vadd.f32 %v1176_v39, %v3885_v41 }
 0x3e9   :  { %2742 = vpow2.f32 %v2244_v38  ;;  %v2245_v48 = vmul.f32 -1.442695, %v1259_v43 }
 0x3eb   :  { %2744 = vpow2.f32 %v2245_v48 }
 0x3f6   :  { %v2743_v59 = vpop.eup %2742 }
 0x3f7   :  { %v1255_v13 = vadd.f32 1.0, %v2743_v59 }
 0x3f8   :  { %v2745_v29 = vpop.eup %2744 }
 0x3f9   :  { %2746 = vrcp.f32 %v1255_v13  ;;  %v1263_v10 = vadd.f32 1.0, %v2745_v29  ;;  %v2247_v13 = vld [vmem:[%s3815_s1 + $0x18] sm:$0xff] }
 0x3fb   :  { %2748 = vrcp.f32 %v1263_v10  ;;  %v3889_v10 = vld [vmem:[#allocation15_spill] sm:$0xff] }
 0x406   :  { %v2747_v9 = vpop.eup %2746 }
 0x407   :  { %v1275_v27 = vmul.f32 %v2747_v9, %v1274_v44  ;;  %v3888_v9 = vld [vmem:[#allocation14_spill] sm:$0xff] }
 0x408   :  { %v2749_v33 = vpop.eup %2748 }
 0x409   :  { %v1276_v31 = vadd.f32 %v1275_v27, %v3233_v60  ;;  %v1278_v35 = vsub.f32 1.0, %v2749_v33  ;;  %v1280_v39 = vmul.f32 %v2749_v33, %v3474_v3  ;;  %v3886_v60 = vld [vmem:[#allocation13_spill] sm:$0xff]  ;;  %v3890_v3 = vld [vmem:[#allocation12_spill] sm:$0xff] }
 0x40a   :  { %v3892_v33 = vld [vmem:[#allocation24_spill] sm:$0xff] }
 0x40b   :  { %2750 = vtanh.f32 %v1276_v31 }
 0x418   :  { %v2751_v37 = vpop.eup %2750 }
 0x419   :  { %v1279_v38 = vmul.f32 %v2751_v37, %v1278_v35 }
 0x41b   :  { %v1281_v41 = vadd.f32 %v1280_v39, %v1279_v38 }
 0x41d   :  { %v3591_v29 = vadd.f32 %v2247_v13, %v1281_v41  ;;  %v3668_v41 = vld [vmem:[%s3820_s6] ss:$0 sm:$0xff] }
 0x41f   :  { %1286 = vst [vmem:[#allocation7 + $0x18] sm:$0xff] %v3591_v29  ;;  %1400 = vmatmul.mubr.f32.vlgmr.msra.gmra.mxu0 %v3591_v29  ;;  %2596 = vmatmul.mubr.f32.vlgmr.msra.gmra.mxu1 %v3591_v29 }
 0x420   :  { %1563 = vmatpush1.msra.mxu0 %v3485_v42  ;;  %2599 = vmatpush3.msra.mxu1 %v3487_v36 }
 0x421   :  { %1564 = vmatprep.subr.mxu0 %v3376_v5  ;;  %2600 = vmatprep.subr.mxu1 %v3867_v45 }
 0x422   :  { %1565 = vmatpush1.msra.mxu0 %v3379_v28  ;;  %2601 = vmatpush3.msra.mxu1 %v3493_v19 }
 0x423   :  { %1566 = vmatprep.subr.mxu0 %v3382_v34  ;;  %2602 = vmatprep.subr.mxu1 %v3867_v45 }
 0x424   :  { %1567 = vmatpush1.msra.mxu0 %v3385_v40  ;;  %2603 = vmatpush3.msra.mxu1 %v3499_v11 }
 0x425   :  { %1568 = vmatprep.subr.mxu0 %v3388_v46  ;;  %2604 = vmatprep.subr.mxu1 %v3867_v45 }
 0x426   :  { %1569 = vmatpush1.msra.mxu0 %v3391_v49  ;;  %2605 = vmatpush3.msra.mxu1 %v3505_v12 }
 0x427   :  { %1570 = vmatprep.subr.mxu0 %v3394_v50  ;;  %2606 = vmatprep.subr.mxu1 %v3867_v45 }
 0x428   :  { %1571 = vmatpush1.msra.mxu0 %v3397_v51  ;;  %2607 = vmatpush3.msra.mxu1 %v3511_v14 }
 0x429   :  { %1572 = vmatprep.subr.mxu0 %v3400_v52  ;;  %2608 = vmatprep.subr.mxu1 %v3867_v45 }
 0x42a   :  { %1573 = vmatpush1.msra.mxu0 %v3403_v53  ;;  %2609 = vmatpush3.msra.mxu1 %v3517_v15 }
 0x42b   :  { %1574 = vmatprep.subr.mxu0 %v3406_v54  ;;  %2610 = vmatprep.subr.mxu1 %v3867_v45 }
 0x42c   :  { %1575 = vmatpush1.msra.mxu0 %v3409_v55  ;;  %2611 = vmatpush3.msra.mxu1 %v3523_v16 }
 0x42d   :  { %1576 = vmatprep.subr.mxu0 %v3411_v56  ;;  %2612 = vmatprep.subr.mxu1 %v3867_v45 }
 0x42e   :  { %1577 = vmatpush1.msra.mxu0 %v3413_v57  ;;  %2613 = vmatpush3.msra.mxu1 %v3525_v18 }
 0x42f   :  { %1578 = vmatprep.subr.mxu0 %v3416_v58  ;;  %2614 = vmatprep.subr.mxu1 %v3867_v45 }
 0x430   :  { %1579 = vmatpush1.msra.mxu0 %v3419_v0  ;;  %2615 = vmatpush3.msra.mxu1 %v3531_v20 }
 0x431   :  { %1580 = vmatprep.subr.mxu0 %v3422_v2  ;;  %2616 = vmatprep.subr.mxu1 %v3867_v45 }
 0x432   :  { %1581 = vmatpush1.msra.mxu0 %v3425_v63  ;;  %2617 = vmatpush3.msra.mxu1 %v3537_v21 }
 0x433   :  { %1582 = vmatprep.subr.mxu0 %v3428_v1  ;;  %2618 = vmatprep.subr.mxu1 %v3867_v45 }
 0x434   :  { %1583 = vmatpush1.msra.mxu0 %v3431_v30  ;;  %2619 = vmatpush3.msra.mxu1 %v3543_v22 }
 0x435   :  { %1584 = vmatprep.subr.mxu0 %v3434_v62  ;;  %2620 = vmatprep.subr.mxu1 %v3867_v45 }
 0x436   :  { %1585 = vmatpush1.msra.mxu0 %v3437_v17  ;;  %2621 = vmatpush3.msra.mxu1 %v3549_v23 }
 0x437   :  { %1586 = vmatprep.subr.mxu0 %v3440_v8  ;;  %2622 = vmatprep.subr.mxu1 %v3867_v45 }
 0x438   :  { %1587 = vmatpush1.msra.mxu0 %v3443_v4  ;;  %2623 = vmatpush3.msra.mxu1 %v3555_v25 }
 0x439   :  { %1588 = vmatprep.subr.mxu0 %v3446_v24  ;;  %2624 = vmatprep.subr.mxu1 %v3867_v45 }
 0x43a   :  { %1589 = vmatpush1.msra.mxu0 %v3449_v47  ;;  %2625 = vmatpush3.msra.mxu1 %v3561_v26 }
 0x43b   :  { %1590 = vmatprep.subr.mxu0 %v3452_v6  ;;  %2626 = vmatprep.subr.mxu1 %v3867_v45 }
 0x43c   :  { %1591 = vmatpush1.msra.mxu0 %v3455_v7  ;;  %2627 = vmatpush3.msra.mxu1 %v3886_v60 }
 0x43d   :  { %1592 = vmatprep.subr.mxu0 %v3887_v61  ;;  %2628 = vmatprep.subr.mxu1 %v3867_v45 }
 0x43e   :  { %1593 = vmatpush1.msra.mxu0 %v3888_v9  ;;  %1626 = vmatprep.mubr.f32.mxu0 %v3867_v45 }
 0x43f   :  { %2629 = vmatpush3.msra.mxu1 %v3889_v10  ;;  %2630 = vmatprep.mubr.msk.f32.mxu1 %vm2840_vm2, %v3867_v45 }
 0x440   :  { %1789 = vmatprep.subr.mxu0 %v3890_v3  ;;  %2633 = vmatprep.subr.mxu1 %v3867_v45 }
 0x4df   :  { %v1401_v44 = vpop.f32.mrf.mxu0  ;;  %v1472_v27 = vpop.f32.mrf.mxu1 }
 0x4e0   :  { %v1478_v43 = vadd.f32 %v1401_v44, %v3891_v32  ;;  %v1501_v44 = vadd.f32 %v3668_v41, %v1472_v27  ;;  %v1980_v27 = vld [vmem:[#allocation4 + $0x60] sm:$0xff] }
 0x4e1   :  { %v2597_v48 = vpop.f32.mrf.mxu1  ;;  %v1403_v31 = vpop.f32.mrf.mxu0 }
 0x4e2   :  { %v2248_v59 = vmul.f32 -1.442695, %v1478_v43  ;;  %v1486_v35 = vadd.f32 %v1403_v31, %v3892_v33  ;;  %v3893_v48 = vld [vmem:[#allocation32_spill] sm:$0xff] }
 0x4e4   :  { %2752 = vpow2.f32 %v2248_v59  ;;  %v2249_v37 = vmul.f32 -1.442695, %v1486_v35 }
 0x4e6   :  { %2754 = vpow2.f32 %v2249_v37 }
 0x4f1   :  { %v2753_v38 = vpop.eup %2752 }
 0x4f2   :  { %v1482_v39 = vadd.f32 1.0, %v2753_v38 }
 0x4f3   :  { %v2755_v13 = vpop.eup %2754 }
 0x4f4   :  { %2756 = vrcp.f32 %v1482_v39  ;;  %v1490_v3 = vadd.f32 1.0, %v2755_v13  ;;  %v2251_v39 = vld [vmem:[%s3815_s1 + $0x20] sm:$0xff] }
 0x4f6   :  { %2758 = vrcp.f32 %v1490_v3  ;;  %v1981_v3 = vld [vmem:[#allocation4 + $0x68] sm:$0xff] }
 0x501   :  { %v2757_v32 = vpop.eup %2756 }
 0x502   :  { %v1502_v43 = vmul.f32 %v2757_v32, %v1501_v44  ;;  %v1978_v44 = vld [vmem:[#allocation4 + $0x50] sm:$0xff]  ;;  %v1977_v32 = vld [vmem:[#allocation4 + $0x48] sm:$0xff] }
 0x503   :  { %v2759_v31 = vpop.eup %2758 }
 0x504   :  { %v1503_v59 = vadd.f32 %v1502_v43, %v3893_v48  ;;  %v1505_v33 = vsub.f32 1.0, %v2759_v31  ;;  %v1507_v38 = vmul.f32 %v2759_v31, %v3591_v29  ;;  %v1975_v43 = vld [vmem:[#allocation4 + $0x38] sm:$0xff]  ;;  %v1974_v48 = vld [vmem:[#allocation4 + $0x30] sm:$0xff] }
 0x505   :  { %v1971_v31 = vld [vmem:[#allocation4 + $0x18] sm:$0xff] }
 0x506   :  { %2760 = vtanh.f32 %v1503_v59  ;;  %v1972_v59 = vld [vmem:[#allocation4 + $0x20] sm:$0xff] }
 0x513   :  { %v2761_v35 = vpop.eup %2760 }
 0x514   :  { %v1506_v37 = vmul.f32 %v2761_v35, %v1505_v33  ;;  %v1969_v33 = vld [vmem:[#allocation4 + $0x8] sm:$0xff]  ;;  %v1968_v35 = vld [vmem:[#allocation4] sm:$0xff] }
 0x516   :  { %v1508_v10 = vadd.f32 %v1507_v38, %v1506_v37 }
 0x518   :  { %v3676_v13 = vadd.f32 %v2251_v39, %v1508_v10  ;;  %v1983_v10 = vld [vmem:[#allocation4 + $0x78] sm:$0xff]  ;;  %v3899_v39 = vld [vmem:[#allocation27_spill] sm:$0xff] }
 0x51a   :  { %1513 = vst [vmem:[#allocation7 + $0x20] sm:$0xff] %v3676_v13  ;;  %1627 = vmatmul.mubr.f32.vlgmr.msra.gmra.mxu0 %v3676_v13  ;;  %2631 = vmatmul.mubr.f32.vlgmr.msra.gmra.mxu1 %v3676_v13 }
 0x51b   :  { %1790 = vmatpush1.msra.mxu0 %v3485_v42  ;;  %2634 = vmatpush3.msra.mxu1 %v3487_v36 }
 0x51c   :  { %1791 = vmatprep.subr.mxu0 %v3376_v5  ;;  %2635 = vmatprep.subr.mxu1 %v3867_v45  ;;  %v3894_v5 = vld [vmem:[#allocation15_spill] sm:$0xff] }
 0x51d   :  { %1792 = vmatpush1.msra.mxu0 %v3379_v28  ;;  %2636 = vmatpush3.msra.mxu1 %v3493_v19  ;;  %v3895_v28 = vld [vmem:[#allocation12_spill] sm:$0xff] }
 0x51e   :  { %1793 = vmatprep.subr.mxu0 %v3382_v34  ;;  %2637 = vmatprep.subr.mxu1 %v3867_v45 }
 0x51f   :  { %1794 = vmatpush1.msra.mxu0 %v3385_v40  ;;  %2638 = vmatpush3.msra.mxu1 %v3499_v11 }
 0x520   :  { %1795 = vmatprep.subr.mxu0 %v3388_v46  ;;  %2639 = vmatprep.subr.mxu1 %v3867_v45  ;;  %v3896_v46 = vld [vmem:[#allocation25_spill] sm:$0xff] }
 0x521   :  { %1796 = vmatpush1.msra.mxu0 %v3391_v49  ;;  %2640 = vmatpush3.msra.mxu1 %v3505_v12 }
 0x522   :  { %1797 = vmatprep.subr.mxu0 %v3394_v50  ;;  %2641 = vmatprep.subr.mxu1 %v3867_v45 }
 0x523   :  { %1798 = vmatpush1.msra.mxu0 %v3397_v51  ;;  %2642 = vmatpush3.msra.mxu1 %v3511_v14 }
 0x524   :  { %1799 = vmatprep.subr.mxu0 %v3400_v52  ;;  %2643 = vmatprep.subr.mxu1 %v3867_v45 }
 0x525   :  { %1800 = vmatpush1.msra.mxu0 %v3403_v53  ;;  %2644 = vmatpush3.msra.mxu1 %v3517_v15  ;;  %v3897_v53 = vld [vmem:[#allocation26_spill] sm:$0xff] }
 0x526   :  { %1801 = vmatprep.subr.mxu0 %v3406_v54  ;;  %2645 = vmatprep.subr.mxu1 %v3867_v45 }
 0x527   :  { %1802 = vmatpush1.msra.mxu0 %v3409_v55  ;;  %2646 = vmatpush3.msra.mxu1 %v3523_v16 }
 0x528   :  { %1803 = vmatprep.subr.mxu0 %v3411_v56  ;;  %2647 = vmatprep.subr.mxu1 %v3867_v45 }
 0x529   :  { %1804 = vmatpush1.msra.mxu0 %v3413_v57  ;;  %2648 = vmatpush3.msra.mxu1 %v3525_v18 }
 0x52a   :  { %1805 = vmatprep.subr.mxu0 %v3416_v58  ;;  %2649 = vmatprep.subr.mxu1 %v3867_v45 }
 0x52b   :  { %1806 = vmatpush1.msra.mxu0 %v3419_v0  ;;  %2650 = vmatpush3.msra.mxu1 %v3531_v20 }
 0x52c   :  { %1807 = vmatprep.subr.mxu0 %v3422_v2  ;;  %2651 = vmatprep.subr.mxu1 %v3867_v45 }
 0x52d   :  { %1808 = vmatpush1.msra.mxu0 %v3425_v63  ;;  %2652 = vmatpush3.msra.mxu1 %v3537_v21 }
 0x52e   :  { %1809 = vmatprep.subr.mxu0 %v3428_v1  ;;  %2653 = vmatprep.subr.mxu1 %v3867_v45 }
 0x52f   :  { %1810 = vmatpush1.msra.mxu0 %v3431_v30  ;;  %2654 = vmatpush3.msra.mxu1 %v3543_v22  ;;  %v3898_v30 = vld [vmem:[#allocation31_spill] sm:$0xff] }
 0x530   :  { %1811 = vmatprep.subr.mxu0 %v3434_v62  ;;  %2655 = vmatprep.subr.mxu1 %v3867_v45 }
 0x531   :  { %1812 = vmatpush1.msra.mxu0 %v3437_v17  ;;  %2656 = vmatpush3.msra.mxu1 %v3549_v23 }
 0x532   :  { %1813 = vmatprep.subr.mxu0 %v3440_v8  ;;  %2657 = vmatprep.subr.mxu1 %v3867_v45 }
 0x533   :  { %1814 = vmatpush1.msra.mxu0 %v3443_v4  ;;  %2658 = vmatpush3.msra.mxu1 %v3555_v25 }
 0x534   :  { %1815 = vmatprep.subr.mxu0 %v3446_v24  ;;  %2659 = vmatprep.subr.mxu1 %v3867_v45 }
 0x535   :  { %1816 = vmatpush1.msra.mxu0 %v3449_v47  ;;  %2660 = vmatpush3.msra.mxu1 %v3561_v26 }
 0x536   :  { %1817 = vmatprep.subr.mxu0 %v3452_v6  ;;  %2661 = vmatprep.subr.mxu1 %v3867_v45  ;;  %v2255_v6 = vld [vmem:[%s3815_s1 + $0x28] sm:$0xff] }
 0x537   :  { %1818 = vmatpush1.msra.mxu0 %v3455_v7  ;;  %2662 = vmatpush3.msra.mxu1 %v3886_v60 }
 0x538   :  { %1819 = vmatprep.subr.mxu0 %v3887_v61  ;;  %2663 = vmatprep.subr.mxu1 %v3867_v45  ;;  %v1986_v61 = vld [vmem:[#allocation4 + $0x90] sm:$0xff] }
 0x539   :  { %1820 = vmatpush1.msra.mxu0 %v3888_v9  ;;  %1853 = vmatprep.mubr.f32.mxu0 %v3867_v45  ;;  %v1984_v9 = vld [vmem:[#allocation4 + $0x80] sm:$0xff] }
 0x53a   :  { %2664 = vmatpush3.msra.mxu1 %v3894_v5  ;;  %2665 = vmatprep.mubr.msk.f32.mxu1 %vm2840_vm2, %v3867_v45 }
 0x53b   :  { %2016 = vmatprep.subr.mxu0 %v3895_v28  ;;  %2668 = vmatprep.subr.mxu1 %v3867_v45 }
 0x5da   :  { %v1628_v34 = vpop.f32.mrf.mxu0  ;;  %v1699_v40 = vpop.f32.mrf.mxu1 }
 0x5db   :  { %v1705_v49 = vadd.f32 %v1628_v34, %v3896_v46  ;;  %v1728_v2 = vadd.f32 %v3668_v41, %v1699_v40  ;;  %v3900_v40 = vld [vmem:[#allocation28_spill] sm:$0xff] }
 0x5dc   :  { %v2632_v50 = vpop.f32.mrf.mxu1  ;;  %v1630_v52 = vpop.f32.mrf.mxu0 }
 0x5dd   :  { %v2252_v51 = vmul.f32 -1.442695, %v1705_v49  ;;  %v1713_v54 = vadd.f32 %v1630_v52, %v3897_v53 }
 0x5df   :  { %2762 = vpow2.f32 %v2252_v51  ;;  %v2253_v55 = vmul.f32 -1.442695, %v1713_v54 }
 0x5e1   :  { %2764 = vpow2.f32 %v2253_v55 }
 0x5ec   :  { %v2763_v56 = vpop.eup %2762 }
 0x5ed   :  { %v1709_v57 = vadd.f32 1.0, %v2763_v56 }
 0x5ee   :  { %v2765_v58 = vpop.eup %2764 }
 0x5ef   :  { %2766 = vrcp.f32 %v1709_v57  ;;  %v1717_v0 = vadd.f32 1.0, %v2765_v58  ;;  %v3901_v57 = vld [vmem:[#allocation34_spill] sm:$0xff] }
 0x5f1   :  { %2768 = vrcp.f32 %v1717_v0 }
 0x5fc   :  { %v2767_v63 = vpop.eup %2766 }
 0x5fd   :  { %v1729_v1 = vmul.f32 %v2767_v63, %v1728_v2 }
 0x5fe   :  { %v2769_v17 = vpop.eup %2768 }
 0x5ff   :  { %v1730_v62 = vadd.f32 %v1729_v1, %v3898_v30  ;;  %v1732_v8 = vsub.f32 1.0, %v2769_v17  ;;  %v1734_v47 = vmul.f32 %v2769_v17, %v3676_v13 }
 0x601   :  { %2770 = vtanh.f32 %v1730_v62  ;;  %v2259_v62 = vld [vmem:[%s3815_s1 + $0x30] sm:$0xff] }
 0x60e   :  { %v2771_v4 = vpop.eup %2770 }
 0x60f   :  { %v1733_v24 = vmul.f32 %v2771_v4, %v1732_v8 }
 0x611   :  { %v1735_v7 = vadd.f32 %v1734_v47, %v1733_v24  ;;  %v3902_v47 = vld [vmem:[#allocation29_spill] sm:$0xff] }
 0x613   :  { %v3756_v29 = vadd.f32 %v2255_v6, %v1735_v7 }
 0x615   :  { %1740 = vst [vmem:[#allocation7 + $0x28] sm:$0xff] %v3756_v29  ;;  %1854 = vmatmul.mubr.f32.vlgmr.msra.gmra.mxu0 %v3756_v29  ;;  %2666 = vmatmul.mubr.f32.vlgmr.msra.gmra.mxu1 %v3756_v29 }
 0x616   :  { %2017 = vmatpush1.msra.mxu0 %v3485_v42  ;;  %2669 = vmatpush3.msra.mxu1 %v3487_v36  ;;  %v2011_v42 = vld [vmem:[#allocation4 + $0x158] sm:$0xff]  ;;  %v2010_v36 = vld [vmem:[#allocation4 + $0x150] sm:$0xff] }
 0x617   :  { %2670 = vmatprep.subr.mxu1 %v3867_v45  ;;  %2080 = vmatprep.mubr.f32.mxu0 %v3867_v45 }
 0x618   :  { %2671 = vmatpush3.msra.mxu1 %v3493_v19  ;;  %2700 = vmatprep.mubr.msk.f32.mxu1 %vm2840_vm2, %v3867_v45  ;;  %v2008_v19 = vld [vmem:[#allocation4 + $0x140] sm:$0xff] }
 0x619   :  { %2672 = vmatprep.subr.mxu1 %v3867_v45  ;;  %2018 = vmatprep.subr.mxu0 %v2011_v42 }
 0x61a   :  { %2673 = vmatpush3.msra.mxu1 %v3499_v11  ;;  %2019 = vmatpush1.msra.mxu0 %v2010_v36  ;;  %v2007_v11 = vld [vmem:[#allocation4 + $0x138] sm:$0xff] }
 0x61b   :  { %2674 = vmatprep.subr.mxu1 %v3867_v45  ;;  %2020 = vmatprep.subr.mxu0 %v2008_v19  ;;  %v3903_v19 = vld [vmem:[#allocation30_spill] sm:$0xff] }
 0x61c   :  { %2675 = vmatpush3.msra.mxu1 %v3505_v12  ;;  %2021 = vmatpush1.msra.mxu0 %v2007_v11  ;;  %v2005_v12 = vld [vmem:[#allocation4 + $0x128] sm:$0xff] }
 0x61d   :  { %2676 = vmatprep.subr.mxu1 %v3867_v45  ;;  %2022 = vmatprep.subr.mxu0 %v2005_v12 }
 0x61e   :  { %2677 = vmatpush3.msra.mxu1 %v3511_v14  ;;  %v2004_v14 = vld [vmem:[#allocation4 + $0x120] sm:$0xff] }
 0x61f   :  { %2678 = vmatprep.subr.mxu1 %v3867_v45  ;;  %2023 = vmatpush1.msra.mxu0 %v2004_v14 }
 0x620   :  { %2679 = vmatpush3.msra.mxu1 %v3517_v15  ;;  %v2002_v15 = vld [vmem:[#allocation4 + $0x110] sm:$0xff] }
 0x621   :  { %2680 = vmatprep.subr.mxu1 %v3867_v45  ;;  %2024 = vmatprep.subr.mxu0 %v2002_v15 }
 0x622   :  { %2681 = vmatpush3.msra.mxu1 %v3523_v16  ;;  %v2001_v16 = vld [vmem:[#allocation4 + $0x108] sm:$0xff] }
 0x623   :  { %2682 = vmatprep.subr.mxu1 %v3867_v45  ;;  %2025 = vmatpush1.msra.mxu0 %v2001_v16 }
 0x624   :  { %2683 = vmatpush3.msra.mxu1 %v3525_v18  ;;  %v1999_v18 = vld [vmem:[#allocation4 + $0xf8] sm:$0xff] }
 0x625   :  { %2684 = vmatprep.subr.mxu1 %v3867_v45  ;;  %2026 = vmatprep.subr.mxu0 %v1999_v18 }
 0x626   :  { %2685 = vmatpush3.msra.mxu1 %v3531_v20  ;;  %v1996_v20 = vld [vmem:[#allocation4 + $0xe0] sm:$0xff] }
 0x627   :  { %2686 = vmatprep.subr.mxu1 %v3867_v45 }
 0x628   :  { %2687 = vmatpush3.msra.mxu1 %v3537_v21  ;;  %v1995_v21 = vld [vmem:[#allocation4 + $0xd8] sm:$0xff] }
 0x629   :  { %2688 = vmatprep.subr.mxu1 %v3867_v45 }
 0x62a   :  { %2689 = vmatpush3.msra.mxu1 %v3543_v22  ;;  %v1993_v22 = vld [vmem:[#allocation4 + $0xc8] sm:$0xff] }
 0x62b   :  { %2690 = vmatprep.subr.mxu1 %v3867_v45 }
 0x62c   :  { %2691 = vmatpush3.msra.mxu1 %v3549_v23  ;;  %v1992_v23 = vld [vmem:[#allocation4 + $0xc0] sm:$0xff] }
 0x62d   :  { %2692 = vmatprep.subr.mxu1 %v3867_v45 }
 0x62e   :  { %2693 = vmatpush3.msra.mxu1 %v3555_v25  ;;  %v1990_v25 = vld [vmem:[#allocation4 + $0xb0] sm:$0xff] }
 0x62f   :  { %2694 = vmatprep.subr.mxu1 %v3867_v45 }
 0x630   :  { %2695 = vmatpush3.msra.mxu1 %v3561_v26  ;;  %v1989_v26 = vld [vmem:[#allocation4 + $0xa8] sm:$0xff] }
 0x631   :  { %2696 = vmatprep.subr.mxu1 %v3867_v45 }
 0x632   :  { %2697 = vmatpush3.msra.mxu1 %v3886_v60  ;;  %v1987_v60 = vld [vmem:[#allocation4 + $0x98] sm:$0xff] }
 0x633   :  { %2698 = vmatprep.subr.mxu1 %v3867_v45  ;;  %v1998_v45 = vld [vmem:[#allocation4 + $0xf0] sm:$0xff] }
 0x634   :  { %2699 = vmatpush3.msra.mxu1 %v3894_v5  ;;  %2027 = vmatpush1.msra.mxu0 %v1998_v45 }
 0x635   :  { %2028 = vmatprep.subr.mxu0 %v1996_v20 }
 0x636   :  { %2029 = vmatpush1.msra.mxu0 %v1995_v21  ;;  %v3904_v21 = vld [vmem:[#allocation33_spill] sm:$0xff] }
 0x637   :  { %2030 = vmatprep.subr.mxu0 %v1993_v22 }
 0x638   :  { %2031 = vmatpush1.msra.mxu0 %v1992_v23 }
 0x639   :  { %2032 = vmatprep.subr.mxu0 %v1990_v25 }
 0x63a   :  { %2033 = vmatpush1.msra.mxu0 %v1989_v26 }
 0x63b   :  { %2034 = vmatprep.subr.mxu0 %v1987_v60 }
 0x63c   :  { %2035 = vmatpush1.msra.mxu0 %v1986_v61 }
 0x63d   :  { %2036 = vmatprep.subr.mxu0 %v1984_v9  ;;  %v2263_v9 = vld [vmem:[%s3815_s1 + $0x38] sm:$0xff] }
 0x63e   :  { %2037 = vmatpush1.msra.mxu0 %v1983_v10 }
 0x63f   :  { %2038 = vmatprep.subr.mxu0 %v1981_v3 }
 0x640   :  { %2039 = vmatpush1.msra.mxu0 %v1980_v27 }
 0x641   :  { %2040 = vmatprep.subr.mxu0 %v1978_v44 }
 0x642   :  { %2041 = vmatpush1.msra.mxu0 %v1977_v32 }
 0x643   :  { %2042 = vmatprep.subr.mxu0 %v1975_v43 }
 0x644   :  { %2043 = vmatpush1.msra.mxu0 %v1974_v48 }
 0x645   :  { %2044 = vmatprep.subr.mxu0 %v1972_v59 }
 0x646   :  { %2045 = vmatpush1.msra.mxu0 %v1971_v31 }
 0x647   :  { %2046 = vmatprep.subr.mxu0 %v1969_v33 }
 0x648   :  { %2047 = vmatpush1.msra.mxu0 %v1968_v35 }
 0x6d5   :  { %v1855_v37 = vpop.f32.mrf.mxu0  ;;  %v1926_v38 = vpop.f32.mrf.mxu1 }
 0x6d6   :  { %v1932_v13 = vadd.f32 %v1855_v37, %v3899_v39  ;;  %v1955_v54 = vadd.f32 %v3668_v41, %v1926_v38 }
 0x6d7   :  { %v2667_v5 = vpop.f32.mrf.mxu1  ;;  %v1857_v34 = vpop.f32.mrf.mxu0 }
 0x6d8   :  { %v2256_v28 = vmul.f32 -1.442695, %v1932_v13  ;;  %v1940_v46 = vadd.f32 %v1857_v34, %v3900_v40 }
 0x6da   :  { %2772 = vpow2.f32 %v2256_v28  ;;  %v2257_v49 = vmul.f32 -1.442695, %v1940_v46 }
 0x6dc   :  { %2774 = vpow2.f32 %v2257_v49 }
 0x6e7   :  { %v2773_v50 = vpop.eup %2772 }
 0x6e8   :  { %v1936_v51 = vadd.f32 1.0, %v2773_v50 }
 0x6e9   :  { %v2775_v52 = vpop.eup %2774 }
 0x6ea   :  { %2776 = vrcp.f32 %v1936_v51  ;;  %v1944_v53 = vadd.f32 1.0, %v2775_v52 }
 0x6ec   :  { %2778 = vrcp.f32 %v1944_v53 }
 0x6f7   :  { %v2777_v55 = vpop.eup %2776 }
 0x6f8   :  { %v1956_v56 = vmul.f32 %v2777_v55, %v1955_v54 }
 0x6f9   :  { %v2779_v0 = vpop.eup %2778 }
 0x6fa   :  { %v1957_v58 = vadd.f32 %v1956_v56, %v3901_v57  ;;  %v1959_v2 = vsub.f32 1.0, %v2779_v0  ;;  %v1961_v30 = vmul.f32 %v2779_v0, %v3756_v29 }
 0x6fc   :  { %2780 = vtanh.f32 %v1957_v58 }
 0x709   :  { %v2781_v63 = vpop.eup %2780 }
 0x70a   :  { %v1960_v1 = vmul.f32 %v2781_v63, %v1959_v2 }
 0x70c   :  { %v1962_v17 = vadd.f32 %v1961_v30, %v1960_v1 }
 0x70e   :  { %v1965_v8 = vadd.f32 %v2259_v62, %v1962_v17 }
 0x710   :  { %1967 = vst [vmem:[#allocation7 + $0x30] sm:$0xff] %v1965_v8  ;;  %2081 = vmatmul.mubr.f32.vlgmr.msra.gmra.mxu0 %v1965_v8  ;;  %2701 = vmatmul.mubr.f32.vlgmr.msra.gmra.mxu1 %v1965_v8 }
 0x7d0   :  { %v2082_v4 = vpop.f32.mrf.mxu0  ;;  %v2153_v24 = vpop.f32.mrf.mxu1 }
 0x7d1   :  { %v2159_v6 = vadd.f32 %v2082_v4, %v3902_v47  ;;  %v2182_v18 = vadd.f32 %v3668_v41, %v2153_v24 }
 0x7d2   :  { %v2702_v7 = vpop.f32.mrf.mxu1  ;;  %v2084_v36 = vpop.f32.mrf.mxu0 }
 0x7d3   :  { %v2260_v42 = vmul.f32 -1.442695, %v2159_v6  ;;  %v2167_v11 = vadd.f32 %v2084_v36, %v3903_v19 }
 0x7d5   :  { %2782 = vpow2.f32 %v2260_v42  ;;  %v2261_v29 = vmul.f32 -1.442695, %v2167_v11 }
 0x7d7   :  { %2784 = vpow2.f32 %v2261_v29 }
 0x7e2   :  { %v2783_v12 = vpop.eup %2782 }
 0x7e3   :  { %v2163_v14 = vadd.f32 1.0, %v2783_v12 }
 0x7e4   :  { %v2785_v15 = vpop.eup %2784 }
 0x7e5   :  { %2786 = vrcp.f32 %v2163_v14  ;;  %v2171_v16 = vadd.f32 1.0, %v2785_v15 }
 0x7e7   :  { %2788 = vrcp.f32 %v2171_v16 }
 0x7f2   :  { %v2787_v45 = vpop.eup %2786 }
 0x7f3   :  { %v2183_v20 = vmul.f32 %v2787_v45, %v2182_v18 }
 0x7f4   :  { %v2789_v23 = vpop.eup %2788 }
 0x7f5   :  { %v2184_v22 = vadd.f32 %v2183_v20, %v3904_v21  ;;  %v2186_v25 = vsub.f32 1.0, %v2789_v23  ;;  %v2188_v61 = vmul.f32 %v2789_v23, %v1965_v8 }
 0x7f7   :  { %2790 = vtanh.f32 %v2184_v22 }
 0x804   :  { %v2791_v26 = vpop.eup %2790 }
 0x805   :  { %v2187_v60 = vmul.f32 %v2791_v26, %v2186_v25 }
 0x807   :  { %v2189_v10 = vadd.f32 %v2188_v61, %v2187_v60 }
 0x809   :  { %v2192_v41 = vadd.f32 %v2263_v9, %v2189_v10 }
 0x80b   :  { %2194 = vst [vmem:[#allocation7 + $0x38] sm:$0xff] %v2192_v41 }
 0x80c   :  { %2823 = shalt.err (!%p2820_p9)
}
 0x80d   :  { %s2842_s24 = smov 128   ;;  %s2843_s25 = smov 8  }
 0x80e   :  { %2207 = dma.vmem_to_hbm [thread:$0]  %s2202_s20, 1024, %s3821_s7, [#allocation6], %s2842_s24, %s2842_s24, %s2843_s25  }
 0x80f   :  { %2834 = dma.done.wait [#allocation6], 1024  }
 0x810   :  { %2835 = vsyncadd [#allocation6], 4294966272 }
 0x811   :  { %2211 = vsyncpa [#allocation5], 1 }
 0x812   :  { %2212 = vsyncpa [#allocation6], 1 }

</bundles_post_ra>
